<compile_context>
chip_gen: v6e
topology: v6e:2x2x1
jax: 0.10.0
libtpu: 0.0.40
codegen_flags: <defaults>
</compile_context>

<pallas_src>
import functools

import jax
import jax.numpy as jnp
from jax import lax
from jax.experimental import pallas as pl
from jax.experimental.pallas import tpu as pltpu

LANE = 128


def _round_up(x, m):
    return ((x + m - 1) // m) * m


# ----------------------------------------------------------------------------
# Fused PC-GNN layer kernel.
# grid = (num_batch_tiles, num_relations); relation axis is the reduction axis.
# ----------------------------------------------------------------------------
def _pcgnn_kernel(adj_ref, feat_ref, cfeat_ref, nscore_ref, cscore_ref,
                  wself_ref, wrel_ref, emb_ref, acc_ref, mask_ref, *,
                  rho, normalize):
    """Refs:
      adj_ref    : (bt, N)   bf16  adjacency slab of this relation (streamed)
      feat_ref   : (N, D)    bf16  node features (resident, single-buffered)
      cfeat_ref  : (bt, D)   bf16  center-node features (resident across r)
      nscore_ref : (1, N)    f32   per-node class-1 scores (resident)
      cscore_ref : (bt, 1)   f32   per-center class-1 scores (resident across r)
      wself_ref  : (D, Op)   bf16  self slab of combination weight (resident)
      wrel_ref   : (D, Op)   bf16  relation slab of combination weight (streamed)
      emb_ref    : (bt, Op)  f32   output embeddings (lane-dense, padded)
      acc_ref    : (bt, Op)  f32   accumulator scratch
      mask_ref   : (bt, N)   bf16  relation-invariant pick mask scratch
    """
    r = pl.program_id(1)

    @pl.when(r == 0)
    def _init():
        # Relation-invariant pick mask, computed once per batch tile and
        # reused for all R relations.
        dist = jnp.abs(nscore_ref[...] - cscore_ref[...])           # (bt, N) f32
        mask_ref[...] = (dist <= rho).astype(jnp.bfloat16)
        # Seed the accumulator with the self term: center @ W_self.
        acc_ref[...] = jnp.dot(cfeat_ref[...], wself_ref[...],
                               preferred_element_type=jnp.float32)  # (bt, Op)

    # ---- pick & choose aggregation for this relation (every grid step) -----
    chosen = adj_ref[...] * mask_ref[...]                           # (bt, N) bf16
    denom = jnp.maximum(
        jnp.sum(chosen.astype(jnp.float32), axis=-1, keepdims=True), 1.0)

    agg = jnp.dot(chosen, feat_ref[...],
                  preferred_element_type=jnp.float32)               # (bt, D) f32
    # Mean-normalize AFTER the matmul: (bt, D) mul + EUP approx reciprocal
    # instead of dividing the (bt, N) mask.
    agg = agg * pl.reciprocal(denom, approx=True)

    # Accumulate this relation's slab of the combination matmul.
    acc_ref[...] += jnp.dot(agg.astype(jnp.bfloat16), wrel_ref[...],
                            preferred_element_type=jnp.float32)     # (bt, Op)

    @pl.when(r == pl.num_programs(1) - 1)
    def _finalize():
        acc = jnp.maximum(acc_ref[...], 0.0)                        # ReLU
        if normalize:
            ssq = jnp.sum(acc * acc, axis=-1, keepdims=True)
            acc = acc * lax.rsqrt(jnp.maximum(ssq, 1e-24))          # l2 norm
        emb_ref[...] = acc.astype(emb_ref.dtype)


def pcgnn_fused(adj_bf, feat_bf, cfeat_bf, nscore, cscore, wself_bf, wrel_bf, *,
                rho, normalize, batch_tile):
    """adj_bf: (R, Bp, N) bf16; feat_bf: (N, D) bf16; cfeat_bf: (Bp, D) bf16;
    nscore: (1, N) f32; cscore: (Bp, 1) f32; wself_bf: (D, Op) bf16;
    wrel_bf: (R, D, Op) bf16.   Returns embeds (Bp, Op) f32."""
    num_r, b_p, n = adj_bf.shape
    _, d = feat_bf.shape
    out_p = wself_bf.shape[1]
    bt = batch_tile
    assert b_p % bt == 0, "batch must be padded to a multiple of batch_tile"
    assert out_p % LANE == 0, "out_channels must be padded to a lane multiple"
    nb = b_p // bt
    grid = (nb, num_r)

    # Explicit VMEM budget: streamed slabs double-buffered, resident blocks
    # counted twice (covers the non-single-buffered fallback), 2x headroom.
    # Capped at 64 MiB so the same plan is valid on v7x (64 MiB physical VMEM);
    # v5e / v6e (128 MiB) could go higher if the resident feature matrix grows.
    streamed = 2 * (bt * n + d * out_p) * 2
    resident = 2 * ((n * d + bt * d + d * out_p) * 2 + (n + bt) * 4)
    out_scr = 2 * bt * out_p * 4 + bt * out_p * 4 + bt * n * 2
    vmem_limit = int(min(max(2 * (streamed + resident + out_scr), 32 << 20),
                         64 << 20))

    kernel = functools.partial(_pcgnn_kernel, rho=rho, normalize=normalize)

    def build(single_buffer_resident):
        # Constant-index_map blocks don't need a second pipeline buffer.
        res = ({"pipeline_mode": pl.Buffered(1)} if single_buffer_resident
               else {})
        in_specs = [
            # per-relation adjacency slab (dominant HBM stream), bf16
            pl.BlockSpec((pl.Squeezed(), bt, n), lambda bi, r: (r, bi, 0)),
            pl.BlockSpec((n, d), lambda bi, r: (0, 0), **res),      # features
            pl.BlockSpec((bt, d), lambda bi, r: (bi, 0)),           # center feats
            pl.BlockSpec((1, n), lambda bi, r: (0, 0), **res),      # node scores
            pl.BlockSpec((bt, 1), lambda bi, r: (bi, 0)),           # center scores
            pl.BlockSpec((d, out_p), lambda bi, r: (0, 0), **res),  # W_self
            # per-relation slab of the combination weight
            pl.BlockSpec((pl.Squeezed(), d, out_p), lambda bi, r: (r, 0, 0)),
        ]
        return pl.pallas_call(
            kernel,
            out_shape=jax.ShapeDtypeStruct((b_p, out_p), jnp.float32),
            grid=grid,
            in_specs=in_specs,
            out_specs=pl.BlockSpec((bt, out_p), lambda bi, r: (bi, 0)),
            scratch_shapes=[
                pltpu.VMEM((bt, out_p), jnp.float32),               # accumulator
                pltpu.VMEM((bt, n), jnp.bfloat16),                  # pick mask
            ],
            compiler_params=pltpu.CompilerParams(
                dimension_semantics=("parallel", "arbitrary"),
                vmem_limit_bytes=vmem_limit),
        )

    args = (adj_bf, feat_bf, cfeat_bf, nscore, cscore, wself_bf, wrel_bf)
    try:
        return build(True)(*args)
    except Exception:
        # pl.Buffered(1) on resident inputs not supported by this lowering;
        # fall back to the default double-buffered pipeline.
        return build(False)(*args)


# ----------------------------------------------------------------------------
# PCGNN (one Pick-and-Choose message-passing layer)
# ----------------------------------------------------------------------------
class PCGNNPallas:
    def __init__(self, in_channels, out_channels, num_relations=3, rho=0.5,
                 normalize=True, seed=0, batch_tile=128):
        assert batch_tile % 8 == 0
        self.in_channels = in_channels
        self.out_channels = out_channels
        self.num_relations = num_relations
        self.rho = float(rho)
        self.normalize = normalize
        # On v7x (2 TensorCores/chip) pad the batch so that
        # padded_B / batch_tile >= 2 so the "parallel" axis has >= 2 tiles.
        self.batch_tile = batch_tile
        key = jax.random.PRNGKey(seed)
        k1, k2 = jax.random.split(key)
        # InterAgg.label_clf : Linear(in_channels -> 2)
        self.w_clf = (jax.random.normal(k1, (in_channels, 2), jnp.float32)
                      / jnp.sqrt(jnp.float32(in_channels)))
        # InterAgg combination weight: concat(self + R relation aggs) -> out
        k_in = (num_relations + 1) * in_channels
        self.w_inter = (jax.random.normal(k2, (k_in, out_channels), jnp.float32)
                        / jnp.sqrt(jnp.float32(k_in)))

    def forward(self, features, labels, batch_mask, train_pos_mask, adj_lists,
                train_flag=True):
        """
        features:       (N, in_channels) f32
        labels:         (N,) int32
        batch_mask:     (B,) int32 indices of the batch center nodes
        train_pos_mask: (P,) int32 indices of positive training nodes
        adj_lists:      (R, N, N) f32 dense binary adjacency, one per relation
        returns: embeds (B, out_channels), logits (B, 2)
        """
        # TODO(synk): adaptive per-relation pick thresholds derived from label
        # distances and positive-node oversampling are replaced by fixed rho.
        del labels, train_pos_mask, train_flag
        features = features.astype(jnp.float32)
        num_r, d, out = self.num_relations, self.in_channels, self.out_channels

        b = int(batch_mask.shape[0])
        bt = self.batch_tile
        b_p = _round_up(b, bt)
        pad_b = b_p - b
        batch_mask = batch_mask.astype(jnp.int32)
        batch_mask_p = (jnp.concatenate([batch_mask,
                                         jnp.zeros((pad_b,), jnp.int32)])
                        if pad_b else batch_mask)

        # Plain-JAX glue: gather the batch rows once; the adjacency slab — the
        # dominant HBM stream — is materialized directly in bf16.
        # TODO(synk): move this gather in-kernel (scalar-prefetch batch indices
        # driving per-row DMAs) to avoid materializing (R, Bp, N) in HBM.
        center_feats = features[batch_mask_p]                         # (Bp, D)
        adj_bf = adj_lists[:, batch_mask_p, :].astype(jnp.bfloat16)   # (R, Bp, N)

        # Label-aware classifier hoisted out of the kernel (tiny O(N*D*2) f32
        # matmul): avoids 2-lane MXU shapes, (B,2) masked stores and per-tile
        # recomputation inside the fused kernel.
        logits_all = features @ self.w_clf                            # (N, 2)
        score_all = jax.nn.sigmoid(logits_all[:, 1] - logits_all[:, 0])
        nscore = score_all[None, :]                                   # (1, N)
        cscore = score_all[batch_mask_p][:, None]                     # (Bp, 1)
        logits = logits_all[batch_mask]                               # (B, 2)

        # Split W_inter into the self slab + R relation slabs and zero-pad the
        # output dim to a lane multiple (lane-dense embeds stores):
        #   combined @ W_inter == self @ W[0] + sum_r agg_r @ W[r+1]
        out_p = _round_up(out, LANE)
        w_split = self.w_inter.reshape(num_r + 1, d, out)
        if out_p != out:
            w_split = jnp.pad(w_split, ((0, 0), (0, 0), (0, out_p - out)))

        # bf16 MXU operands; threshold / elementwise math stays f32 in-kernel.
        feat_bf = features.astype(jnp.bfloat16)
        cfeat_bf = center_feats.astype(jnp.bfloat16)
        wself_bf = w_split[0].astype(jnp.bfloat16)                    # (D, Op)
        wrel_bf = w_split[1:].astype(jnp.bfloat16)                    # (R, D, Op)

        embeds_p = pcgnn_fused(
            adj_bf, feat_bf, cfeat_bf, nscore, cscore, wself_bf, wrel_bf,
            rho=self.rho, normalize=self.normalize, batch_tile=bt)
        return embeds_p[:b, :out], logits


if __name__ == "__main__":
    N, D_IN, D_OUT, B, R = 64, 32, 32, 8, 3

    key = jax.random.PRNGKey(0)
    kf, kl, ka = jax.random.split(key, 3)

    features = jax.random.normal(kf, (N, D_IN), jnp.float32)
    labels = jax.random.bernoulli(kl, 0.3, (N,)).astype(jnp.int32)
    batch_mask = jnp.arange(0, N, N // B, dtype=jnp.int32)            # (B,)
    train_pos_mask = jnp.nonzero(labels, size=8, fill_value=0)[0].astype(jnp.int32)
    adj = jax.random.bernoulli(ka, 0.2, (R, N, N)).astype(jnp.float32)
    adj = jnp.maximum(adj, jnp.transpose(adj, (0, 2, 1)))             # symmetric
    adj_lists = adj * (1.0 - jnp.eye(N, dtype=jnp.float32))           # no self loops

    model = PCGNNPallas(in_channels=D_IN, out_channels=D_OUT,
                        num_relations=R, rho=0.5, normalize=True, seed=0,
                        batch_tile=128)

    embeds, logits = model.forward(features, labels, batch_mask,
                                   train_pos_mask, adj_lists, train_flag=True)
    jax.block_until_ready(embeds)
    jax.block_until_ready(logits)

    # ---- sanity checks -----------------------------------------------------
    assert embeds.shape == (B, D_OUT) and logits.shape == (B, 2)
    assert bool(jnp.all(jnp.isfinite(embeds))) and bool(jnp.all(jnp.isfinite(logits)))

    # Center logits are now computed exactly (f32 wrapper matmul).
    logits_all_ref = features @ model.w_clf
    assert bool(jnp.allclose(logits, logits_all_ref[batch_mask],
                             atol=1e-3, rtol=1e-3))

    # Pure-JAX reference of the same simplified PC-GNN layer semantics
    # (loose tolerances: bf16 MXU operands + approx reciprocal in-kernel).
    score_ref = jax.nn.sigmoid(logits_all_ref[:, 1] - logits_all_ref[:, 0])
    dist_ref = jnp.abs(score_ref[None, :] - score_ref[batch_mask][:, None])
    pick_ref = (dist_ref <= model.rho).astype(jnp.float32)            # (B, N)
    w_split_ref = model.w_inter.reshape(R + 1, D_IN, D_OUT)
    comb = features[batch_mask] @ w_split_ref[0]
    for r in range(R):
        chosen = adj_lists[r][batch_mask] * pick_ref
        denom = jnp.maximum(chosen.sum(-1, keepdims=True), 1.0)
        comb = comb + ((chosen @ features) / denom) @ w_split_ref[r + 1]
    comb = jnp.maximum(comb, 0.0)
    norm = jnp.sqrt(jnp.sum(comb * comb, axis=-1, keepdims=True))
    ref_embeds = comb / jnp.maximum(norm, 1e-12)
    assert bool(jnp.allclose(embeds, ref_embeds, atol=5e-2, rtol=5e-2))

    row_norms = jnp.sqrt(jnp.sum(embeds * embeds, axis=-1))
    assert bool(jnp.all(row_norms <= 1.0 + 1e-3))                     # l2-normalized

    print("KERNEL_OK")
</pallas_src>

<mosaic_0001>
module attributes {stable_mosaic.version = 11 : i64} {
  func.func @_pcgnn_kernel(%arg0: i32, %arg1: i32, %arg2: memref<1x128x64xbf16, #tpu.memory_space<vmem>>, %arg3: memref<64x32xbf16, #tpu.memory_space<vmem>>, %arg4: memref<128x32xbf16, #tpu.memory_space<vmem>>, %arg5: memref<1x64xf32, #tpu.memory_space<vmem>>, %arg6: memref<128x1xf32, #tpu.memory_space<vmem>>, %arg7: memref<32x128xbf16, #tpu.memory_space<vmem>>, %arg8: memref<1x32x128xbf16, #tpu.memory_space<vmem>>, %arg9: memref<128x128xf32, #tpu.memory_space<vmem>>, %arg10: memref<128x128xf32, #tpu.memory_space<vmem>>, %arg11: memref<128x64xbf16, #tpu.memory_space<vmem>>) attributes {dimension_semantics = [#tpu.dimension_semantics<parallel>, #tpu.dimension_semantics<arbitrary>], iteration_bounds = array<i64: 1, 3>, scalar_prefetch = 0 : i64, scratch_operands = 2 : i64, tpu.core_type = #tpu.core_type<tc>, window_params = [{transform_indices = @transform_0, window_bounds = array<i64: 1, 128, 64>}, {pipeline_mode = #tpu.pipeline_mode<synchronous>, transform_indices = @transform_1, window_bounds = array<i64: 64, 32>}, {transform_indices = @transform_2, window_bounds = array<i64: 128, 32>}, {pipeline_mode = #tpu.pipeline_mode<synchronous>, transform_indices = @transform_3, window_bounds = array<i64: 1, 64>}, {transform_indices = @transform_4, window_bounds = array<i64: 128, 1>}, {pipeline_mode = #tpu.pipeline_mode<synchronous>, transform_indices = @transform_5, window_bounds = array<i64: 32, 128>}, {transform_indices = @transform_6, window_bounds = array<i64: 1, 32, 128>}, {transform_indices = @transform_7, window_bounds = array<i64: 128, 128>}]} {
    %c0_i32 = arith.constant 0 : i32
    %0 = arith.cmpi eq, %arg1, %c0_i32 : i32
    %1 = arith.extui %0 : i1 to i32
    %c0_i32_0 = arith.constant 0 : i32
    %2 = arith.cmpi ne, %1, %c0_i32_0 : i32
    scf.if %2 {
      %c0_18 = arith.constant 0 : index
      %c0_19 = arith.constant 0 : index
      %27 = vector.load %arg5[%c0_18, %c0_19] : memref<1x64xf32, #tpu.memory_space<vmem>>, vector<1x64xf32>
      %c0_20 = arith.constant 0 : index
      %c0_21 = arith.constant 0 : index
      %28 = vector.load %arg6[%c0_20, %c0_21] : memref<128x1xf32, #tpu.memory_space<vmem>>, vector<128x1xf32>
      %29 = vector.broadcast %27 : vector<1x64xf32> to vector<128x64xf32>
      %30 = vector.broadcast %28 : vector<128x1xf32> to vector<128x64xf32>
      %31 = arith.subf %29, %30 : vector<128x64xf32>
      %32 = math.absf %31 : vector<128x64xf32>
      %cst_22 = arith.constant 5.000000e-01 : f32
      %33 = vector.broadcast %cst_22 : f32 to vector<128x64xf32>
      %34 = arith.cmpf ole, %32, %33 : vector<128x64xf32>
      %35 = arith.extui %34 : vector<128x64xi1> to vector<128x64xi32>
      %36 = arith.sitofp %35 : vector<128x64xi32> to vector<128x64xf32>
      %37 = arith.truncf %36 : vector<128x64xf32> to vector<128x64xbf16>
      %c0_23 = arith.constant 0 : index
      %c0_24 = arith.constant 0 : index
      %38 = vector.load %arg11[%c0_23, %c0_24] : memref<128x64xbf16, #tpu.memory_space<vmem>>, vector<128x64xbf16>
      tpu.vector_store %arg11[%c0_23, %c0_24], %37 {strides = array<i32>} : memref<128x64xbf16, #tpu.memory_space<vmem>>, vector<128x64xbf16>,
      %c0_25 = arith.constant 0 : index
      %c0_26 = arith.constant 0 : index
      %39 = vector.load %arg4[%c0_25, %c0_26] : memref<128x32xbf16, #tpu.memory_space<vmem>>, vector<128x32xbf16>
      %c0_27 = arith.constant 0 : index
      %c0_28 = arith.constant 0 : index
      %40 = vector.load %arg7[%c0_27, %c0_28] : memref<32x128xbf16, #tpu.memory_space<vmem>>, vector<32x128xbf16>
      %cst_29 = arith.constant dense<0.000000e+00> : vector<128x128xf32>
      %41 = tpu.matmul %39, %40, %cst_29 {dimension_numbers = #tpu.dot_dimension_numbers<[1], [0], [0], [1], [0, 0, 1, 1], [], []>} : vector<128x32xbf16>, vector<32x128xbf16>, vector<128x128xf32> -> vector<128x128xf32>
      %c0_30 = arith.constant 0 : index
      %c0_31 = arith.constant 0 : index
      %42 = vector.load %arg10[%c0_30, %c0_31] : memref<128x128xf32, #tpu.memory_space<vmem>>, vector<128x128xf32>
      tpu.vector_store %arg10[%c0_30, %c0_31], %41 {strides = array<i32>} : memref<128x128xf32, #tpu.memory_space<vmem>>, vector<128x128xf32>,
    } else {
    }
    %c0 = arith.constant 0 : index
    %c0_1 = arith.constant 0 : index
    %c0_2 = arith.constant 0 : index
    %3 = vector.load %arg2[%c0, %c0_1, %c0_2] : memref<1x128x64xbf16, #tpu.memory_space<vmem>>, vector<1x128x64xbf16>
    %4 = vector.shape_cast %3 : vector<1x128x64xbf16> to vector<128x64xbf16>
    %c0_3 = arith.constant 0 : index
    %c0_4 = arith.constant 0 : index
    %5 = vector.load %arg11[%c0_3, %c0_4] : memref<128x64xbf16, #tpu.memory_space<vmem>>, vector<128x64xbf16>
    %6 = arith.mulf %4, %5 : vector<128x64xbf16>
    %7 = arith.extf %6 : vector<128x64xbf16> to vector<128x64xf32>
    %cst = arith.constant dense<0.000000e+00> : vector<128xf32>
    %8 = vector.multi_reduction <add>, %7, %cst [1] : vector<128x64xf32> to vector<128xf32>
    %9 = vector.shape_cast %8 : vector<128xf32> to vector<128x1xf32>
    %cst_5 = arith.constant 1.000000e+00 : f32
    %10 = vector.broadcast %cst_5 : f32 to vector<128x1xf32>
    %11 = arith.maximumf %9, %10 : vector<128x1xf32>
    %c0_6 = arith.constant 0 : index
    %c0_7 = arith.constant 0 : index
    %12 = vector.load %arg3[%c0_6, %c0_7] : memref<64x32xbf16, #tpu.memory_space<vmem>>, vector<64x32xbf16>
    %cst_8 = arith.constant dense<0.000000e+00> : vector<128x32xf32>
    %13 = tpu.matmul %6, %12, %cst_8 {dimension_numbers = #tpu.dot_dimension_numbers<[1], [0], [0], [1], [0, 0, 1, 1], [], []>} : vector<128x64xbf16>, vector<64x32xbf16>, vector<128x32xf32> -> vector<128x32xf32>
    %14 = tpu.reciprocal %11 {approx = true} : vector<128x1xf32> -> vector<128x1xf32>
    %15 = vector.broadcast %14 : vector<128x1xf32> to vector<128x32xf32>
    %16 = arith.mulf %13, %15 : vector<128x32xf32>
    %c0_9 = arith.constant 0 : index
    %c0_10 = arith.constant 0 : index
    %17 = vector.load %arg10[%c0_9, %c0_10] : memref<128x128xf32, #tpu.memory_space<vmem>>, vector<128x128xf32>
    %18 = arith.truncf %16 : vector<128x32xf32> to vector<128x32xbf16>
    %c0_11 = arith.constant 0 : index
    %c0_12 = arith.constant 0 : index
    %c0_13 = arith.constant 0 : index
    %19 = vector.load %arg8[%c0_11, %c0_12, %c0_13] : memref<1x32x128xbf16, #tpu.memory_space<vmem>>, vector<1x32x128xbf16>
    %20 = vector.shape_cast %19 : vector<1x32x128xbf16> to vector<32x128xbf16>
    %cst_14 = arith.constant dense<0.000000e+00> : vector<128x128xf32>
    %21 = tpu.matmul %18, %20, %cst_14 {dimension_numbers = #tpu.dot_dimension_numbers<[1], [0], [0], [1], [0, 0, 1, 1], [], []>} : vector<128x32xbf16>, vector<32x128xbf16>, vector<128x128xf32> -> vector<128x128xf32>
    %22 = arith.addf %17, %21 : vector<128x128xf32>
    %c0_15 = arith.constant 0 : index
    %c0_16 = arith.constant 0 : index
    %23 = vector.load %arg10[%c0_15, %c0_16] : memref<128x128xf32, #tpu.memory_space<vmem>>, vector<128x128xf32>
    tpu.vector_store %arg10[%c0_15, %c0_16], %22 {strides = array<i32>} : memref<128x128xf32, #tpu.memory_space<vmem>>, vector<128x128xf32>,
    %c2_i32 = arith.constant 2 : i32
    %24 = arith.cmpi eq, %arg1, %c2_i32 : i32
    %25 = arith.extui %24 : i1 to i32
    %c0_i32_17 = arith.constant 0 : i32
    %26 = arith.cmpi ne, %25, %c0_i32_17 : i32
    scf.if %26 {
      %c0_18 = arith.constant 0 : index
      %c0_19 = arith.constant 0 : index
      %27 = vector.load %arg10[%c0_18, %c0_19] : memref<128x128xf32, #tpu.memory_space<vmem>>, vector<128x128xf32>
      %cst_20 = arith.constant 0.000000e+00 : f32
      %28 = vector.broadcast %cst_20 : f32 to vector<128x128xf32>
      %29 = arith.maximumf %27, %28 : vector<128x128xf32>
      %30 = arith.mulf %29, %29 : vector<128x128xf32>
      %cst_21 = arith.constant dense<0.000000e+00> : vector<128xf32>
      %31 = vector.multi_reduction <add>, %30, %cst_21 [1] : vector<128x128xf32> to vector<128xf32>
      %32 = vector.shape_cast %31 : vector<128xf32> to vector<128x1xf32>
      %cst_22 = arith.constant 1.000000e-24 : f32
      %33 = vector.broadcast %cst_22 : f32 to vector<128x1xf32>
      %34 = arith.maximumf %32, %33 : vector<128x1xf32>
      %35 = math.rsqrt %34 : vector<128x1xf32>
      %36 = vector.broadcast %35 : vector<128x1xf32> to vector<128x128xf32>
      %37 = arith.mulf %29, %36 : vector<128x128xf32>
      %c0_23 = arith.constant 0 : index
      %c0_24 = arith.constant 0 : index
      %38 = vector.load %arg9[%c0_23, %c0_24] : memref<128x128xf32, #tpu.memory_space<vmem>>, vector<128x128xf32>
      tpu.vector_store %arg9[%c0_23, %c0_24], %37 {strides = array<i32>} : memref<128x128xf32, #tpu.memory_space<vmem>>, vector<128x128xf32>,
    } else {
    }
    return
  }
  func.func @transform_0(%arg0: i32, %arg1: i32) -> (i32, i32, i32) {
    %c0_i32 = arith.constant 0 : i32
    %c0_i32_0 = arith.constant 0 : i32
    return %arg1, %arg0, %c0_i32 : i32, i32, i32
  }
  func.func @transform_1(%arg0: i32, %arg1: i32) -> (i32, i32) {
    %c0_i32 = arith.constant 0 : i32
    %c0_i32_0 = arith.constant 0 : i32
    %c0_i32_1 = arith.constant 0 : i32
    return %c0_i32, %c0_i32_0 : i32, i32
  }
  func.func @transform_2(%arg0: i32, %arg1: i32) -> (i32, i32) {
    %c0_i32 = arith.constant 0 : i32
    %c0_i32_0 = arith.constant 0 : i32
    return %arg0, %c0_i32 : i32, i32
  }
  func.func @transform_3(%arg0: i32, %arg1: i32) -> (i32, i32) {
    %c0_i32 = arith.constant 0 : i32
    %c0_i32_0 = arith.constant 0 : i32
    %c0_i32_1 = arith.constant 0 : i32
    return %c0_i32, %c0_i32_0 : i32, i32
  }
  func.func @transform_4(%arg0: i32, %arg1: i32) -> (i32, i32) {
    %c0_i32 = arith.constant 0 : i32
    %c0_i32_0 = arith.constant 0 : i32
    return %arg0, %c0_i32 : i32, i32
  }
  func.func @transform_5(%arg0: i32, %arg1: i32) -> (i32, i32) {
    %c0_i32 = arith.constant 0 : i32
    %c0_i32_0 = arith.constant 0 : i32
    %c0_i32_1 = arith.constant 0 : i32
    return %c0_i32, %c0_i32_0 : i32, i32
  }
  func.func @transform_6(%arg0: i32, %arg1: i32) -> (i32, i32, i32) {
    %c0_i32 = arith.constant 0 : i32
    %c0_i32_0 = arith.constant 0 : i32
    %c0_i32_1 = arith.constant 0 : i32
    return %arg1, %c0_i32, %c0_i32_0 : i32, i32, i32
  }
  func.func @transform_7(%arg0: i32, %arg1: i32) -> (i32, i32) {
    %c0_i32 = arith.constant 0 : i32
    %c0_i32_0 = arith.constant 0 : i32
    return %arg0, %c0_i32 : i32, i32
  }
}

module attributes {stable_mosaic.version = 11 : i64} {
  func.func @_pcgnn_kernel(%arg0: i32, %arg1: i32, %arg2: memref<1x128x64xbf16, #tpu.memory_space<vmem>>, %arg3: memref<64x32xbf16, #tpu.memory_space<vmem>>, %arg4: memref<128x32xbf16, #tpu.memory_space<vmem>>, %arg5: memref<1x64xf32, #tpu.memory_space<vmem>>, %arg6: memref<128x1xf32, #tpu.memory_space<vmem>>, %arg7: memref<32x128xbf16, #tpu.memory_space<vmem>>, %arg8: memref<1x32x128xbf16, #tpu.memory_space<vmem>>, %arg9: memref<128x128xf32, #tpu.memory_space<vmem>>, %arg10: memref<128x128xf32, #tpu.memory_space<vmem>>, %arg11: memref<128x64xbf16, #tpu.memory_space<vmem>>) attributes {dimension_semantics = [#tpu.dimension_semantics<parallel>, #tpu.dimension_semantics<arbitrary>], iteration_bounds = array<i64: 1, 3>, scalar_prefetch = 0 : i64, scratch_operands = 2 : i64, tpu.core_type = #tpu.core_type<tc>, window_params = [{transform_indices = @transform_0, window_bounds = array<i64: 1, 128, 64>}, {pipeline_mode = #tpu.pipeline_mode<synchronous>, transform_indices = @transform_1, window_bounds = array<i64: 64, 32>}, {transform_indices = @transform_2, window_bounds = array<i64: 128, 32>}, {pipeline_mode = #tpu.pipeline_mode<synchronous>, transform_indices = @transform_3, window_bounds = array<i64: 1, 64>}, {transform_indices = @transform_4, window_bounds = array<i64: 128, 1>}, {pipeline_mode = #tpu.pipeline_mode<synchronous>, transform_indices = @transform_5, window_bounds = array<i64: 32, 128>}, {transform_indices = @transform_6, window_bounds = array<i64: 1, 32, 128>}, {transform_indices = @transform_7, window_bounds = array<i64: 128, 128>}]} {
    %c0_i32 = arith.constant 0 : i32
    %0 = arith.cmpi eq, %arg1, %c0_i32 : i32
    %1 = arith.extui %0 : i1 to i32
    %c0_i32_0 = arith.constant 0 : i32
    %2 = arith.cmpi ne, %1, %c0_i32_0 : i32
    scf.if %2 {
      %c0_18 = arith.constant 0 : index
      %c0_19 = arith.constant 0 : index
      %27 = vector.load %arg5[%c0_18, %c0_19] : memref<1x64xf32, #tpu.memory_space<vmem>>, vector<1x64xf32>
      %c0_20 = arith.constant 0 : index
      %c0_21 = arith.constant 0 : index
      %28 = vector.load %arg6[%c0_20, %c0_21] : memref<128x1xf32, #tpu.memory_space<vmem>>, vector<128x1xf32>
      %29 = vector.broadcast %27 : vector<1x64xf32> to vector<128x64xf32>
      %30 = vector.broadcast %28 : vector<128x1xf32> to vector<128x64xf32>
      %31 = arith.subf %29, %30 : vector<128x64xf32>
      %32 = math.absf %31 : vector<128x64xf32>
      %cst_22 = arith.constant 5.000000e-01 : f32
      %33 = vector.broadcast %cst_22 : f32 to vector<128x64xf32>
      %34 = arith.cmpf ole, %32, %33 : vector<128x64xf32>
      %35 = arith.extui %34 : vector<128x64xi1> to vector<128x64xi32>
      %36 = arith.sitofp %35 : vector<128x64xi32> to vector<128x64xf32>
      %37 = arith.truncf %36 : vector<128x64xf32> to vector<128x64xbf16>
      %c0_23 = arith.constant 0 : index
      %c0_24 = arith.constant 0 : index
      %38 = vector.load %arg11[%c0_23, %c0_24] : memref<128x64xbf16, #tpu.memory_space<vmem>>, vector<128x64xbf16>
      tpu.vector_store %arg11[%c0_23, %c0_24], %37 {strides = array<i32>} : memref<128x64xbf16, #tpu.memory_space<vmem>>, vector<128x64xbf16>,
      %c0_25 = arith.constant 0 : index
      %c0_26 = arith.constant 0 : index
      %39 = vector.load %arg4[%c0_25, %c0_26] : memref<128x32xbf16, #tpu.memory_space<vmem>>, vector<128x32xbf16>
      %c0_27 = arith.constant 0 : index
      %c0_28 = arith.constant 0 : index
      %40 = vector.load %arg7[%c0_27, %c0_28] : memref<32x128xbf16, #tpu.memory_space<vmem>>, vector<32x128xbf16>
      %cst_29 = arith.constant dense<0.000000e+00> : vector<128x128xf32>
      %41 = tpu.matmul %39, %40, %cst_29 {dimension_numbers = #tpu.dot_dimension_numbers<[1], [0], [0], [1], [0, 0, 1, 1], [], []>} : vector<128x32xbf16>, vector<32x128xbf16>, vector<128x128xf32> -> vector<128x128xf32>
      %c0_30 = arith.constant 0 : index
      %c0_31 = arith.constant 0 : index
      %42 = vector.load %arg10[%c0_30, %c0_31] : memref<128x128xf32, #tpu.memory_space<vmem>>, vector<128x128xf32>
      tpu.vector_store %arg10[%c0_30, %c0_31], %41 {strides = array<i32>} : memref<128x128xf32, #tpu.memory_space<vmem>>, vector<128x128xf32>,
    } else {
    }
    %c0 = arith.constant 0 : index
    %c0_1 = arith.constant 0 : index
    %c0_2 = arith.constant 0 : index
    %3 = vector.load %arg2[%c0, %c0_1, %c0_2] : memref<1x128x64xbf16, #tpu.memory_space<vmem>>, vector<1x128x64xbf16>
    %4 = vector.shape_cast %3 : vector<1x128x64xbf16> to vector<128x64xbf16>
    %c0_3 = arith.constant 0 : index
    %c0_4 = arith.constant 0 : index
    %5 = vector.load %arg11[%c0_3, %c0_4] : memref<128x64xbf16, #tpu.memory_space<vmem>>, vector<128x64xbf16>
    %6 = arith.mulf %4, %5 : vector<128x64xbf16>
    %7 = arith.extf %6 : vector<128x64xbf16> to vector<128x64xf32>
    %cst = arith.constant dense<0.000000e+00> : vector<128xf32>
    %8 = vector.multi_reduction <add>, %7, %cst [1] : vector<128x64xf32> to vector<128xf32>
    %9 = vector.shape_cast %8 : vector<128xf32> to vector<128x1xf32>
    %cst_5 = arith.constant 1.000000e+00 : f32
    %10 = vector.broadcast %cst_5 : f32 to vector<128x1xf32>
    %11 = arith.maximumf %9, %10 : vector<128x1xf32>
    %c0_6 = arith.constant 0 : index
    %c0_7 = arith.constant 0 : index
    %12 = vector.load %arg3[%c0_6, %c0_7] : memref<64x32xbf16, #tpu.memory_space<vmem>>, vector<64x32xbf16>
    %cst_8 = arith.constant dense<0.000000e+00> : vector<128x32xf32>
    %13 = tpu.matmul %6, %12, %cst_8 {dimension_numbers = #tpu.dot_dimension_numbers<[1], [0], [0], [1], [0, 0, 1, 1], [], []>} : vector<128x64xbf16>, vector<64x32xbf16>, vector<128x32xf32> -> vector<128x32xf32>
    %14 = tpu.reciprocal %11 {approx = true} : vector<128x1xf32> -> vector<128x1xf32>
    %15 = vector.broadcast %14 : vector<128x1xf32> to vector<128x32xf32>
    %16 = arith.mulf %13, %15 : vector<128x32xf32>
    %c0_9 = arith.constant 0 : index
    %c0_10 = arith.constant 0 : index
    %17 = vector.load %arg10[%c0_9, %c0_10] : memref<128x128xf32, #tpu.memory_space<vmem>>, vector<128x128xf32>
    %18 = arith.truncf %16 : vector<128x32xf32> to vector<128x32xbf16>
    %c0_11 = arith.constant 0 : index
    %c0_12 = arith.constant 0 : index
    %c0_13 = arith.constant 0 : index
    %19 = vector.load %arg8[%c0_11, %c0_12, %c0_13] : memref<1x32x128xbf16, #tpu.memory_space<vmem>>, vector<1x32x128xbf16>
    %20 = vector.shape_cast %19 : vector<1x32x128xbf16> to vector<32x128xbf16>
    %cst_14 = arith.constant dense<0.000000e+00> : vector<128x128xf32>
    %21 = tpu.matmul %18, %20, %cst_14 {dimension_numbers = #tpu.dot_dimension_numbers<[1], [0], [0], [1], [0, 0, 1, 1], [], []>} : vector<128x32xbf16>, vector<32x128xbf16>, vector<128x128xf32> -> vector<128x128xf32>
    %22 = arith.addf %17, %21 : vector<128x128xf32>
    %c0_15 = arith.constant 0 : index
    %c0_16 = arith.constant 0 : index
    %23 = vector.load %arg10[%c0_15, %c0_16] : memref<128x128xf32, #tpu.memory_space<vmem>>, vector<128x128xf32>
    tpu.vector_store %arg10[%c0_15, %c0_16], %22 {strides = array<i32>} : memref<128x128xf32, #tpu.memory_space<vmem>>, vector<128x128xf32>,
    %c2_i32 = arith.constant 2 : i32
    %24 = arith.cmpi eq, %arg1, %c2_i32 : i32
    %25 = arith.extui %24 : i1 to i32
    %c0_i32_17 = arith.constant 0 : i32
    %26 = arith.cmpi ne, %25, %c0_i32_17 : i32
    scf.if %26 {
      %c0_18 = arith.constant 0 : index
      %c0_19 = arith.constant 0 : index
      %27 = vector.load %arg10[%c0_18, %c0_19] : memref<128x128xf32, #tpu.memory_space<vmem>>, vector<128x128xf32>
      %cst_20 = arith.constant 0.000000e+00 : f32
      %28 = vector.broadcast %cst_20 : f32 to vector<128x128xf32>
      %29 = arith.maximumf %27, %28 : vector<128x128xf32>
      %30 = arith.mulf %29, %29 : vector<128x128xf32>
      %cst_21 = arith.constant dense<0.000000e+00> : vector<128xf32>
      %31 = vector.multi_reduction <add>, %30, %cst_21 [1] : vector<128x128xf32> to vector<128xf32>
      %32 = vector.shape_cast %31 : vector<128xf32> to vector<128x1xf32>
      %cst_22 = arith.constant 1.000000e-24 : f32
      %33 = vector.broadcast %cst_22 : f32 to vector<128x1xf32>
      %34 = arith.maximumf %32, %33 : vector<128x1xf32>
      %35 = math.rsqrt %34 : vector<128x1xf32>
      %36 = vector.broadcast %35 : vector<128x1xf32> to vector<128x128xf32>
      %37 = arith.mulf %29, %36 : vector<128x128xf32>
      %c0_23 = arith.constant 0 : index
      %c0_24 = arith.constant 0 : index
      %38 = vector.load %arg9[%c0_23, %c0_24] : memref<128x128xf32, #tpu.memory_space<vmem>>, vector<128x128xf32>
      tpu.vector_store %arg9[%c0_23, %c0_24], %37 {strides = array<i32>} : memref<128x128xf32, #tpu.memory_space<vmem>>, vector<128x128xf32>,
    } else {
    }
    return
  }
  func.func @transform_0(%arg0: i32, %arg1: i32) -> (i32, i32, i32) {
    %c0_i32 = arith.constant 0 : i32
    %c0_i32_0 = arith.constant 0 : i32
    return %arg1, %arg0, %c0_i32 : i32, i32, i32
  }
  func.func @transform_1(%arg0: i32, %arg1: i32) -> (i32, i32) {
    %c0_i32 = arith.constant 0 : i32
    %c0_i32_0 = arith.constant 0 : i32
    %c0_i32_1 = arith.constant 0 : i32
    return %c0_i32, %c0_i32_0 : i32, i32
  }
  func.func @transform_2(%arg0: i32, %arg1: i32) -> (i32, i32) {
    %c0_i32 = arith.constant 0 : i32
    %c0_i32_0 = arith.constant 0 : i32
    return %arg0, %c0_i32 : i32, i32
  }
  func.func @transform_3(%arg0: i32, %arg1: i32) -> (i32, i32) {
    %c0_i32 = arith.constant 0 : i32
    %c0_i32_0 = arith.constant 0 : i32
    %c0_i32_1 = arith.constant 0 : i32
    return %c0_i32, %c0_i32_0 : i32, i32
  }
  func.func @transform_4(%arg0: i32, %arg1: i32) -> (i32, i32) {
    %c0_i32 = arith.constant 0 : i32
    %c0_i32_0 = arith.constant 0 : i32
    return %arg0, %c0_i32 : i32, i32
  }
  func.func @transform_5(%arg0: i32, %arg1: i32) -> (i32, i32) {
    %c0_i32 = arith.constant 0 : i32
    %c0_i32_0 = arith.constant 0 : i32
    %c0_i32_1 = arith.constant 0 : i32
    return %c0_i32, %c0_i32_0 : i32, i32
  }
  func.func @transform_6(%arg0: i32, %arg1: i32) -> (i32, i32, i32) {
    %c0_i32 = arith.constant 0 : i32
    %c0_i32_0 = arith.constant 0 : i32
    %c0_i32_1 = arith.constant 0 : i32
    return %arg1, %c0_i32, %c0_i32_0 : i32, i32, i32
  }
  func.func @transform_7(%arg0: i32, %arg1: i32) -> (i32, i32) {
    %c0_i32 = arith.constant 0 : i32
    %c0_i32_0 = arith.constant 0 : i32
    return %arg0, %c0_i32 : i32, i32
  }
}

</mosaic_0001>

<bundles_post_ra>
// kernel: tpu_custom_call.1
= control target key start
LH: loop header
LB: loop body
LE: loop exit
PB: predicated region body
PF: predicated region fallthrough
CT: control target
= control target key end

     0   :  { %12 = vsyncpa [#allocation5], 0  ;;  %s2077_s24 = smov 0   ;;  %s2079_s25 = smov 0   ;;  %s2419_s0 = inlined_call_operand.vmem [shape: bf16[3,128,64], index: 0, kind: input, shape index: {}]   ;;  %s2420_s1 = inlined_call_operand.vmem [shape: bf16[64,32], index: 1, kind: input, shape index: {}]   ;;  %s2421_s2 = inlined_call_operand.vmem [shape: bf16[128,32], index: 2, kind: input, shape index: {}]   ;;  %s2422_s3 = inlined_call_operand.vmem [shape: f32[1,64], index: 3, kind: input, shape index: {}]   ;;  %s2423_s4 = inlined_call_operand.vmem [shape: f32[128,1], index: 4, kind: input, shape index: {}]   ;;  %s2424_s5 = inlined_call_operand.vmem [shape: bf16[32,128], index: 5, kind: input, shape index: {}]   ;;  %s2425_s6 = inlined_call_operand.vmem [shape: bf16[3,32,128], index: 6, kind: input, shape index: {}]   ;;  %s2426_s7 = inlined_call_operand.hbm [shape: f32[128,128], index: 7, kind: output, shape index: {}]  }
   0x1   :  { %s2081_s26 = smov 0  }
   0x2 LB: > { %s1648_s27 = sadd.s32 4294967295, %s2030_s26   ;;  %s27_s28 = sadd.s32 1, %s2026_s25  ;;  %s2030_s26 = sphi %s2081_s26, %s18_s26   ;;  %s2026_s25 = sphi %s2079_s25, %s2429_s25   ;;  %s2022_s24 = sphi %s2077_s24, %s2428_s24  }
   0x3   : > { %p28_p0 = scmp.ge.s32.totalorder %s27_s28, 3  ;;  %p1653_p1 = scmp.ge.s32.totalorder %s2030_s26, 1 }
   0x4   : > { %p289_p2 = scmp.lt.s32.totalorder %s2030_s26, 4 }
   0x5   : > { %s2431_s28 = smov (%p28_p0, %s27_s28), 0 }
   0x6   : > { %p290_p3 = pnand %p1653_p1, %p289_p2 }
   0x7   : > { %p336_p4 = scmp.lt.s32.totalorder (!%p290_p3), %s2022_s24, 2  ;;  %p1658_p5 = scmp.ne.s32.totalorder (!%p290_p3), %s2022_s24, 0 }
   0x8   : > { %293 = sbr.rel (%p290_p3) target bundleno = 890 (0x37a), region = 48 }
   0xd   : > { %s337_s29 = scalar_select %p336_p4, %s2022_s24, 2 }
   0xe   : > { %367 = sbr.rel (%p1658_p5) target bundleno = 236 (0xec), region = 52 }
   0xf   : > { %s1745_s30 = sshll.u32 %s337_s29, 6  ;;  %s1746_s8 = sshll.u32 %s337_s29, 4 }
  0x10   : > { %s2103_s11 = scalar_lea.vmem %s2419_s0, %s1745_s30  ;;  %s2108_s14 = scalar_lea.vmem %s2425_s6, %s1746_s8 }
  0x13   : > { %v1900_v0 = vld [vmem:[%s2424_s5 + $0x8] sm:$0xff]   ;;  %v1901_v1 = vld [vmem:[%s2424_s5] sm:$0xff]   ;;  %vm704_vm0 = vcmask 261120   ;;  %v1906_v6 = vld [vmem:[%s2421_s2 + $0x10] sm:$0xff]   ;;  %v2032_v7 = vmov 0   ;;  %vm615_vm3 = vcmask 519168  }
  0x14   : > { %1795 = vmatprep.subr.bf16.mxu0 %v1900_v0  ;;  %1859 = vmatprep.subr.bf16.mxu1 %v1900_v0  ;;  %v1902_v2 = vld [vmem:[%s2421_s2] sm:$0xff]   ;;  %v1904_v4 = vld [vmem:[%s2421_s2 + $0x8] sm:$0xff]   ;;  %v1907_v8 = vld [vmem:[%s2421_s2 + $0x30] sm:$0xff]   ;;  %v2033_v38 = vmov 0.0  }
  0x15   : > { %1796 = vmatpush3.bf16.msra.mxu0 %v1900_v0  ;;  %1861 = vmatpush3.bf16.msra.mxu1 %v1900_v0  ;;  %v1903_v3 = vld [vmem:[%s2421_s2 + $0x20] sm:$0xff]   ;;  %v1905_v5 = vld [vmem:[%s2421_s2 + $0x28] sm:$0xff]   ;;  %v371_v9 = vld [vmem:[%s2423_s4 + $0x10] sm:$0xff] }
  0x16   : > { %1797 = vmatprep.subr.bf16.mxu0 %v1901_v1  ;;  %1860 = vmatprep.subr.bf16.mxu1 %v1901_v1  ;;  %v369_v10 = vld [vmem:[%s2423_s4] sm:$0xff]  ;;  %v372_v11 = vld [vmem:[%s2423_s4 + $0x18] sm:$0xff]  ;;  %v370_v12 = vld [vmem:[%s2423_s4 + $0x8] sm:$0xff] }
  0x17   : > { %1799 = vmatprep.mubr.msk.bf16.mxu0 %vm704_vm0, %v1902_v2  ;;  %1807 = vmatprep.mubr.msk.bf16.mxu1 %vm704_vm0, %v1903_v3  ;;  %v1908_v13 = vld [vmem:[%s2421_s2 + $0x18] sm:$0xff]   ;;  %v374_v15 = vld [vmem:[%s2423_s4 + $0x28] sm:$0xff]  ;;  %v373_v16 = vld [vmem:[%s2423_s4 + $0x20] sm:$0xff] }
  0x18   : > { %1899 = vset.pattern.permute.xlu1 %v2032_v7  ;;  %1898 = vset.pattern.permute.xlu0 %v2032_v7  ;;  %v1909_v14 = vld [vmem:[%s2421_s2 + $0x38] sm:$0xff]   ;;  %v375_v18 = vld [vmem:[%s2423_s4 + $0x30] sm:$0xff]  ;;  %v378_v19 = vld [vmem:[%s2423_s4 + $0x48] sm:$0xff] }
  0x19   : > { %1798 = vmatpush3.bf16.msra.mxu0 %v1901_v1  ;;  %1862 = vmatpush3.bf16.msra.mxu1 %v1901_v1  ;;  %v376_v17 = vld [vmem:[%s2423_s4 + $0x38] sm:$0xff]  ;;  %v377_v20 = vld [vmem:[%s2423_s4 + $0x40] sm:$0xff]  ;;  %v379_v22 = vld [vmem:[%s2423_s4 + $0x50] sm:$0xff] }
  0x1a   : > { %403 = vperm.xlu1 %1899, %v371_v9   ;;  %393 = vperm.xlu0 %1898, %v369_v10   ;;  %v380_v21 = vld [vmem:[%s2423_s4 + $0x58] sm:$0xff]  ;;  %v382_v23 = vld [vmem:[%s2423_s4 + $0x68] sm:$0xff]  ;;  %v381_v24 = vld [vmem:[%s2423_s4 + $0x60] sm:$0xff] }
  0x1b   : > { %v384_v25 = vld [vmem:[%s2423_s4 + $0x78] sm:$0xff]  ;;  %v383_v26 = vld [vmem:[%s2423_s4 + $0x70] sm:$0xff]  ;;  %v2200_v27 = vld [vmem:[%s2422_s3] ss:$0 sm:$0xff] }
  0x1c   : > { %1800 = vmatmul.mubr.msk.bf16.vlgmr.msra.gmra.mxu0 %vm704_vm0, %v1904_v4  ;;  %1808 = vmatmul.mubr.msk.bf16.vlgmr.msra.gmra.mxu1 %vm704_vm0, %v1905_v5 }
  0x1d   : > { %1803 = vmatprep.mubr.msk.bf16.mxu0 %vm704_vm0, %v1906_v6  ;;  %1811 = vmatprep.mubr.msk.bf16.mxu1 %vm704_vm0, %v1907_v8 }
  0x1e   : > { %408 = vperm.xlu1 %1899, %v372_v11   ;;  %398 = vperm.xlu0 %1898, %v370_v12  }
  0x22   : > { %418 = vperm.xlu1 %1899, %v374_v15   ;;  %413 = vperm.xlu0 %1898, %v373_v16  }
  0x24   : > { %1804 = vmatmul.mubr.msk.bf16.gmra.mxu0 %vm704_vm0, %v1908_v13  ;;  %1812 = vmatmul.mubr.msk.bf16.gmra.mxu1 %vm704_vm0, %v1909_v14 }
  0x26   : > { %428 = vperm.xlu1 %1899, %v376_v17   ;;  %423 = vperm.xlu0 %1898, %v375_v18  }
  0x2a   : > { %438 = vperm.xlu1 %1899, %v378_v19   ;;  %433 = vperm.xlu0 %1898, %v377_v20  }
  0x2e   : > { %448 = vperm.xlu1 %1899, %v380_v21   ;;  %443 = vperm.xlu0 %1898, %v379_v22  }
  0x32   : > { %458 = vperm.xlu1 %1899, %v382_v23   ;;  %453 = vperm.xlu0 %1898, %v381_v24  }
  0x36   : > { %468 = vperm.xlu1 %1899, %v384_v25   ;;  %463 = vperm.xlu0 %1898, %v383_v26  }
  0x95   : > { %v404_v28 = vpop.permute.xlu1 %403  ;;  %v394_v29 = vpop.permute.xlu0 %393 }
  0x96   : > { %v473_v30 = vsub.f32 %v2200_v27, %v404_v28  ;;  %v471_v31 = vsub.f32 %v2200_v27, %v394_v29 }
  0x98   : > { %v489_v32 = vand.u32 2147483647, %v473_v30  ;;  %v487_v33 = vand.u32 2147483647, %v471_v31 }
  0x99   : > { %v409_v34 = vpop.permute.xlu1 %408  ;;  %v399_v35 = vpop.permute.xlu0 %398 }
  0x9a   : > { %vm505_vm1 = vcmp.le.f32.partialorder %v489_v32, 0.5  ;;  %vm503_vm2 = vcmp.le.f32.partialorder %v487_v33, 0.5  ;;  %v474_v36 = vsub.f32 %v2200_v27, %v409_v34  ;;  %v472_v37 = vsub.f32 %v2200_v27, %v399_v35 }
  0x9b   : > { %v1662_v39 = vsel %vm505_vm1, 1.0, %v2033_v38  ;;  %v1660_v40 = vsel %vm503_vm2, 1.0, %v2033_v38 }
  0x9c   : > { %v1749_v41 = vpack.c.bf16 %v1662_v39, %v1662_v39  ;;  %v1747_v42 = vpack.c.bf16 %v1660_v40, %v1660_v40  ;;  %v490_v43 = vand.u32 2147483647, %v474_v36  ;;  %v488_v44 = vand.u32 2147483647, %v472_v37 }
  0x9d   : > { %v419_v45 = vpop.permute.xlu1 %418  ;;  %v414_v46 = vpop.permute.xlu0 %413 }
  0x9e   : > { %618 = vst.msk [vmem:[#allocation3 + $0x8] sm:$0xf] %vm615_vm3, %v1749_v41  ;;  %616 = vst.msk [vmem:[#allocation3] sm:$0xf] %vm615_vm3, %v1747_v42  ;;  %vm506_vm4 = vcmp.le.f32.partialorder %v490_v43, 0.5  ;;  %vm504_vm5 = vcmp.le.f32.partialorder %v488_v44, 0.5  ;;  %v476_v47 = vsub.f32 %v2200_v27, %v419_v45  ;;  %v475_v48 = vsub.f32 %v2200_v27, %v414_v46 }
  0x9f   : > { %v1663_v49 = vsel %vm506_vm4, 1.0, %v2033_v38  ;;  %v1661_v50 = vsel %vm504_vm5, 1.0, %v2033_v38 }
  0xa0   : > { %v1750_v51 = vpack.c.bf16 %v1663_v49, %v1663_v49  ;;  %v1748_v52 = vpack.c.bf16 %v1661_v50, %v1661_v50  ;;  %v492_v53 = vand.u32 2147483647, %v476_v47  ;;  %v491_v54 = vand.u32 2147483647, %v475_v48 }
  0xa1   : > { %v429_v55 = vpop.permute.xlu1 %428  ;;  %v424_v56 = vpop.permute.xlu0 %423 }
  0xa2   : > { %619 = vst.msk [vmem:[#allocation3 + $0xc] sm:$0xf] %vm615_vm3, %v1750_v51  ;;  %617 = vst.msk [vmem:[#allocation3 + $0x4] sm:$0xf] %vm615_vm3, %v1748_v52  ;;  %vm508_vm6 = vcmp.le.f32.partialorder %v492_v53, 0.5  ;;  %vm507_vm7 = vcmp.le.f32.partialorder %v491_v54, 0.5  ;;  %v478_v57 = vsub.f32 %v2200_v27, %v429_v55  ;;  %v477_v58 = vsub.f32 %v2200_v27, %v424_v56 }
  0xa3   : > { %v1665_v59 = vsel %vm508_vm6, 1.0, %v2033_v38  ;;  %v1664_v60 = vsel %vm507_vm7, 1.0, %v2033_v38 }
  0xa4   : > { %v1752_v61 = vpack.c.bf16 %v1665_v59, %v1665_v59  ;;  %v1751_v62 = vpack.c.bf16 %v1664_v60, %v1664_v60  ;;  %v494_v63 = vand.u32 2147483647, %v478_v57  ;;  %v493_v0 = vand.u32 2147483647, %v477_v58 }
  0xa5   : > { %v439_v1 = vpop.permute.xlu1 %438  ;;  %v434_v2 = vpop.permute.xlu0 %433 }
  0xa6   : > { %621 = vst.msk [vmem:[#allocation3 + $0x14] sm:$0xf] %vm615_vm3, %v1752_v61  ;;  %620 = vst.msk [vmem:[#allocation3 + $0x10] sm:$0xf] %vm615_vm3, %v1751_v62  ;;  %vm510_vm8 = vcmp.le.f32.partialorder %v494_v63, 0.5  ;;  %vm509_vm9 = vcmp.le.f32.partialorder %v493_v0, 0.5  ;;  %v480_v3 = vsub.f32 %v2200_v27, %v439_v1  ;;  %v479_v4 = vsub.f32 %v2200_v27, %v434_v2 }
  0xa7   : > { %v1667_v5 = vsel %vm510_vm8, 1.0, %v2033_v38  ;;  %v1666_v6 = vsel %vm509_vm9, 1.0, %v2033_v38 }
  0xa8   : > { %v1754_v7 = vpack.c.bf16 %v1667_v5, %v1667_v5  ;;  %v1753_v8 = vpack.c.bf16 %v1666_v6, %v1666_v6  ;;  %v496_v9 = vand.u32 2147483647, %v480_v3  ;;  %v495_v10 = vand.u32 2147483647, %v479_v4 }
  0xa9   : > { %v449_v11 = vpop.permute.xlu1 %448  ;;  %v444_v12 = vpop.permute.xlu0 %443 }
  0xaa   : > { %623 = vst.msk [vmem:[#allocation3 + $0x1c] sm:$0xf] %vm615_vm3, %v1754_v7  ;;  %622 = vst.msk [vmem:[#allocation3 + $0x18] sm:$0xf] %vm615_vm3, %v1753_v8  ;;  %vm512_vm10 = vcmp.le.f32.partialorder %v496_v9, 0.5  ;;  %vm511_vm11 = vcmp.le.f32.partialorder %v495_v10, 0.5  ;;  %v482_v13 = vsub.f32 %v2200_v27, %v449_v11  ;;  %v481_v14 = vsub.f32 %v2200_v27, %v444_v12 }
  0xab   : > { %v1669_v15 = vsel %vm512_vm10, 1.0, %v2033_v38  ;;  %v1668_v16 = vsel %vm511_vm11, 1.0, %v2033_v38 }
  0xac   : > { %v1756_v17 = vpack.c.bf16 %v1669_v15, %v1669_v15  ;;  %v1755_v18 = vpack.c.bf16 %v1668_v16, %v1668_v16  ;;  %v498_v19 = vand.u32 2147483647, %v482_v13  ;;  %v497_v20 = vand.u32 2147483647, %v481_v14 }
  0xad   : > { %v459_v21 = vpop.permute.xlu1 %458  ;;  %v454_v22 = vpop.permute.xlu0 %453 }
  0xae   : > { %625 = vst.msk [vmem:[#allocation3 + $0x24] sm:$0xf] %vm615_vm3, %v1756_v17  ;;  %624 = vst.msk [vmem:[#allocation3 + $0x20] sm:$0xf] %vm615_vm3, %v1755_v18  ;;  %vm514_vm12 = vcmp.le.f32.partialorder %v498_v19, 0.5  ;;  %vm513_vm13 = vcmp.le.f32.partialorder %v497_v20, 0.5  ;;  %v484_v23 = vsub.f32 %v2200_v27, %v459_v21  ;;  %v483_v24 = vsub.f32 %v2200_v27, %v454_v22 }
  0xaf   : > { %v1671_v25 = vsel %vm514_vm12, 1.0, %v2033_v38  ;;  %v1670_v26 = vsel %vm513_vm13, 1.0, %v2033_v38 }
  0xb0   : > { %v1758_v28 = vpack.c.bf16 %v1671_v25, %v1671_v25  ;;  %v1757_v29 = vpack.c.bf16 %v1670_v26, %v1670_v26  ;;  %v500_v30 = vand.u32 2147483647, %v484_v23  ;;  %v499_v31 = vand.u32 2147483647, %v483_v24 }
  0xb1   : > { %v469_v32 = vpop.permute.xlu1 %468  ;;  %v464_v33 = vpop.permute.xlu0 %463 }
  0xb2   : > { %627 = vst.msk [vmem:[#allocation3 + $0x2c] sm:$0xf] %vm615_vm3, %v1758_v28  ;;  %626 = vst.msk [vmem:[#allocation3 + $0x28] sm:$0xf] %vm615_vm3, %v1757_v29  ;;  %vm516_vm14 = vcmp.le.f32.partialorder %v500_v30, 0.5  ;;  %vm515_vm15 = vcmp.le.f32.partialorder %v499_v31, 0.5  ;;  %v486_v34 = vsub.f32 %v2200_v27, %v469_v32  ;;  %v485_v35 = vsub.f32 %v2200_v27, %v464_v33 }
  0xb3   : > { %v1673_v36 = vsel %vm516_vm14, 1.0, %v2033_v38  ;;  %v1672_v37 = vsel %vm515_vm15, 1.0, %v2033_v38 }
  0xb4   : > { %v1760_v39 = vpack.c.bf16 %v1673_v36, %v1673_v36  ;;  %v1759_v40 = vpack.c.bf16 %v1672_v37, %v1672_v37  ;;  %v502_v41 = vand.u32 2147483647, %v486_v34  ;;  %v501_v42 = vand.u32 2147483647, %v485_v35 }
  0xb6   : > { %629 = vst.msk [vmem:[#allocation3 + $0x34] sm:$0xf] %vm615_vm3, %v1760_v39  ;;  %628 = vst.msk [vmem:[#allocation3 + $0x30] sm:$0xf] %vm615_vm3, %v1759_v40  ;;  %vm518_vm0 = vcmp.le.f32.partialorder %v502_v41, 0.5  ;;  %vm517_vm1 = vcmp.le.f32.partialorder %v501_v42, 0.5 }
  0xb7   : > { %v1675_v43 = vsel %vm518_vm0, 1.0, %v2033_v38  ;;  %v1674_v44 = vsel %vm517_vm1, 1.0, %v2033_v38 }
  0xb8   : > { %v1762_v45 = vpack.c.bf16 %v1675_v43, %v1675_v43  ;;  %v1761_v27 = vpack.c.bf16 %v1674_v44, %v1674_v44 }
  0xba   : > { %631 = vst.msk [vmem:[#allocation3 + $0x3c] sm:$0xf] %vm615_vm3, %v1762_v45  ;;  %630 = vst.msk [vmem:[#allocation3 + $0x38] sm:$0xf] %vm615_vm3, %v1761_v27 }
  0xdc   : > { %v1801_v46 = vpop.f32.mrf.mxu0  ;;  %v1809_v47 = vpop.f32.mrf.mxu1 }
  0xdd   : > { %828 = vst [vmem:[#allocation2 + $0x58] sm:$0xff] %v1801_v46  ;;  %836 = vst [vmem:[#allocation2 + $0x10] sm:$0xff] %v1809_v47 }
  0xde   : > { %v763_v48 = vpop.f32.mrf.mxu0  ;;  %v795_v49 = vpop.f32.mrf.mxu1 }
  0xdf   : > { %826 = vst [vmem:[#allocation2 + $0x30] sm:$0xff] %v763_v48  ;;  %834 = vst [vmem:[#allocation2 + $0x40] sm:$0xff] %v795_v49 }
  0xe0   : > { %v1802_v50 = vpop.f32.mrf.mxu0  ;;  %v1810_v51 = vpop.f32.mrf.mxu1 }
  0xe1   : > { %829 = vst [vmem:[#allocation2 + $0x18] sm:$0xff] %v1802_v50  ;;  %837 = vst [vmem:[#allocation2 + $0x38] sm:$0xff] %v1810_v51 }
  0xe2   : > { %v766_v52 = vpop.f32.mrf.mxu0  ;;  %v798_v38 = vpop.f32.mrf.mxu1 }
  0xe3   : > { %827 = vst [vmem:[#allocation2] sm:$0xff] %v766_v52  ;;  %835 = vst [vmem:[#allocation2 + $0x20] sm:$0xff] %v798_v38 }
  0xe4   : > { %v1805_v53 = vpop.f32.mrf.mxu0  ;;  %v1813_v54 = vpop.f32.mrf.mxu1 }
  0xe5   : > { %832 = vst [vmem:[#allocation2 + $0x8] sm:$0xff] %v1805_v53  ;;  %840 = vst [vmem:[#allocation2 + $0x78] sm:$0xff] %v1813_v54 }
  0xe6   : > { %v779_v55 = vpop.f32.mrf.mxu0  ;;  %v811_v56 = vpop.f32.mrf.mxu1 }
  0xe7   : > { %830 = vst [vmem:[#allocation2 + $0x50] sm:$0xff] %v779_v55  ;;  %838 = vst [vmem:[#allocation2 + $0x60] sm:$0xff] %v811_v56 }
  0xe8   : > { %v1806_v57 = vpop.f32.mrf.mxu0  ;;  %v1814_v58 = vpop.f32.mrf.mxu1 }
  0xe9   : > { %833 = vst [vmem:[#allocation2 + $0x48] sm:$0xff] %v1806_v57  ;;  %841 = vst [vmem:[#allocation2 + $0x28] sm:$0xff] %v1814_v58 }
  0xea   : > { %v782_v59 = vpop.f32.mrf.mxu0  ;;  %v814_v60 = vpop.f32.mrf.mxu1 }
  0xeb   : > { %831 = vst [vmem:[#allocation2 + $0x68] sm:$0xff] %v782_v59  ;;  %839 = vst [vmem:[#allocation2 + $0x70] sm:$0xff] %v814_v60 }
  0xec PF: > { %v1910_v61 = vld [vmem:[%s2420_s1 + $0x18] sm:$0xff]   ;;  %v1911_v62 = vld [vmem:[%s2420_s1 + $0x10] sm:$0xff]   ;;  %v1912_v63 = vld [vmem:[%s2420_s1 + $0x8] sm:$0xff]   ;;  %vm906_vm2 = vcmask 523264   ;;  %vm1236_vm3 = vcmask 261120   ;;  %p1740_p6 = scmp.ne.s32.totalorder %s2022_s24, 2 }
  0xed   : > { %1815 = vmatprep.subr.bf16.mxu0 %v1910_v61  ;;  %v842_v0 = vld [vmem:[%s2103_s11] sm:$0xf]  ;;  %v843_v1 = vld [vmem:[%s2103_s11 + $0x4] sm:$0xf]  ;;  %v844_v5 = vld [vmem:[%s2103_s11 + $0x8] sm:$0xf] }
  0xee   : > { %1816 = vmatpush3.bf16.msra.mxu0 %v1910_v61  ;;  %v858_v2 = vld [vmem:[#allocation3] sm:$0xf]  ;;  %v859_v3 = vld [vmem:[#allocation3 + $0x4] sm:$0xf]  ;;  %v860_v8 = vld [vmem:[#allocation3 + $0x8] sm:$0xf] }
  0xef   : > { %1817 = vmatprep.subr.bf16.mxu0 %v1911_v62  ;;  %v874_v4 = vmul.bf16 %v858_v2, %v842_v0  ;;  %v1913_v6 = vld [vmem:[%s2420_s1] sm:$0xff]   ;;  %v875_v7 = vmul.bf16 %v859_v3, %v843_v1  ;;  %v845_v9 = vld [vmem:[%s2103_s11 + $0xc] sm:$0xf]  ;;  %v846_v11 = vld [vmem:[%s2103_s11 + $0x10] sm:$0xf]  ;;  %v876_v13 = vmul.bf16 %v860_v8, %v844_v5 }
  0xf0   : > { %v861_v10 = vld [vmem:[#allocation3 + $0xc] sm:$0xf]  ;;  %v847_v14 = vld [vmem:[%s2103_s11 + $0x14] sm:$0xf]  ;;  %v862_v15 = vld [vmem:[#allocation3 + $0x10] sm:$0xf] }
  0xf1   : > { %v1710_v12 = vcombine.low %v874_v4, %v875_v7  ;;  %v863_v16 = vld [vmem:[#allocation3 + $0x14] sm:$0xf]  ;;  %v877_v17 = vmul.bf16 %v861_v10, %v845_v9  ;;  %v890_v18 = vunpack.c.l.bf16 %v874_v4  ;;  %v892_v19 = vunpack.c.l.bf16 %v876_v13  ;;  %v848_v23 = vld [vmem:[%s2103_s11 + $0x18] sm:$0xf]  ;;  %v849_v24 = vld [vmem:[%s2103_s11 + $0x1c] sm:$0xf] }
  0xf2   : > { %1818 = vmatpush3.bf16.msra.mxu0 %v1911_v62  ;;  %v878_v20 = vmul.bf16 %v862_v15, %v846_v11  ;;  %v879_v21 = vmul.bf16 %v863_v16, %v847_v14  ;;  %v891_v22 = vunpack.c.l.bf16 %v875_v7  ;;  %v864_v25 = vld [vmem:[#allocation3 + $0x18] sm:$0xf]  ;;  %v865_v26 = vld [vmem:[#allocation3 + $0x1c] sm:$0xf]  ;;  %v850_v30 = vld [vmem:[%s2103_s11 + $0x20] sm:$0xf] }
  0xf3   : > { %1819 = vmatprep.subr.bf16.mxu0 %v1912_v63  ;;  %1823 = vmatprep.mubr.msk.bf16.mxu0 %vm906_vm2, %v1710_v12  ;;  %v893_v28 = vunpack.c.l.bf16 %v877_v17  ;;  %v1711_v29 = vcombine.low %v876_v13, %v877_v17  ;;  %v851_v31 = vld [vmem:[%s2103_s11 + $0x24] sm:$0xf]  ;;  %v907_v32 = vsel %vm906_vm2, %v890_v18, 0.0  ;;  %v913_v33 = vsel %vm906_vm2, %v892_v19, 0.0  ;;  %v866_v35 = vld [vmem:[#allocation3 + $0x20] sm:$0xf] }
  0xf4   : > { %v1712_v34 = vcombine.low %v878_v20, %v879_v21  ;;  %908 = vadd.xlane.f32.xlu0 %v907_v32  ;;  %v867_v36 = vld [vmem:[#allocation3 + $0x24] sm:$0xf]  ;;  %914 = vadd.xlane.f32.xlu1 %v913_v33  ;;  %v910_v37 = vsel %vm906_vm2, %v891_v22, 0.0  ;;  %v894_v39 = vunpack.c.l.bf16 %v878_v20  ;;  %v895_v41 = vunpack.c.l.bf16 %v879_v21  ;;  %v852_v50 = vld [vmem:[%s2103_s11 + $0x28] sm:$0xf] }
  0xf5   : > { %v916_v40 = vsel %vm906_vm2, %v893_v28, 0.0  ;;  %v880_v42 = vmul.bf16 %v864_v25, %v848_v23  ;;  %v881_v43 = vmul.bf16 %v865_v26, %v849_v24  ;;  %v882_v44 = vmul.bf16 %v866_v35, %v850_v30  ;;  %v853_v51 = vld [vmem:[%s2103_s11 + $0x2c] sm:$0xf]  ;;  %v868_v52 = vld [vmem:[#allocation3 + $0x28] sm:$0xf]  ;;  %v1915_v26 = vld [vmem:[%s2108_s14] sm:$0xff]  }
  0xf6   : > { %1820 = vmatpush3.bf16.msra.mxu0 %v1912_v63  ;;  %v883_v45 = vmul.bf16 %v867_v36, %v851_v31  ;;  %v919_v27 = vsel %vm906_vm2, %v894_v39, 0.0  ;;  %v922_v47 = vsel %vm906_vm2, %v895_v41, 0.0  ;;  %v869_v53 = vld [vmem:[#allocation3 + $0x2c] sm:$0xf]  ;;  %v854_v54 = vld [vmem:[%s2103_s11 + $0x30] sm:$0xf]  ;;  %v884_v62 = vmul.bf16 %v868_v52, %v852_v50 }
  0xf7   : > { %1821 = vmatprep.subr.bf16.mxu0 %v1913_v6  ;;  %v896_v46 = vunpack.c.l.bf16 %v880_v42  ;;  %v897_v48 = vunpack.c.l.bf16 %v881_v43  ;;  %v1713_v49 = vcombine.low %v880_v42, %v881_v43  ;;  %v855_v55 = vld [vmem:[%s2103_s11 + $0x34] sm:$0xf]  ;;  %v870_v56 = vld [vmem:[#allocation3 + $0x30] sm:$0xf]  ;;  %v898_v59 = vunpack.c.l.bf16 %v882_v44  ;;  %v856_v7 = vld [vmem:[%s2103_s11 + $0x38] sm:$0xf] }
  0xf8   : > { %911 = vadd.xlane.f32.xlu0 %v910_v37  ;;  %917 = vadd.xlane.f32.xlu1 %v916_v40  ;;  %v1714_v38 = vcombine.low %v882_v44, %v883_v45  ;;  %v871_v57 = vld [vmem:[#allocation3 + $0x34] sm:$0xf]  ;;  %v899_v61 = vunpack.c.l.bf16 %v883_v45  ;;  %v885_v63 = vmul.bf16 %v869_v53, %v853_v51  ;;  %v886_v0 = vmul.bf16 %v870_v56, %v854_v54  ;;  %v857_v9 = vld [vmem:[%s2103_s11 + $0x3c] sm:$0xf]  ;;  %v872_v10 = vld [vmem:[#allocation3 + $0x38] sm:$0xf] }
  0xf9   : > { %v925_v58 = vsel %vm906_vm2, %v896_v46, 0.0  ;;  %v928_v60 = vsel %vm906_vm2, %v897_v48, 0.0  ;;  %v887_v1 = vmul.bf16 %v871_v57, %v855_v55  ;;  %v931_v2 = vsel %vm906_vm2, %v898_v59, 0.0  ;;  %v873_v11 = vld [vmem:[#allocation3 + $0x3c] sm:$0xf]  ;;  %v1914_v25 = vld [vmem:[%s2108_s14 + $0x8] sm:$0xff]  }
  0xfa   : > { %1822 = vmatpush3.bf16.msra.mxu0 %v1913_v6  ;;  %v900_v3 = vunpack.c.l.bf16 %v884_v62  ;;  %v934_v4 = vsel %vm906_vm2, %v899_v61, 0.0  ;;  %v901_v5 = vunpack.c.l.bf16 %v885_v63  ;;  %v1715_v6 = vcombine.low %v884_v62, %v885_v63  ;;  %1839 = vmatprep.subr.bf16.mxu1 %v1914_v25 }
  0xfb   : > { %v1716_v8 = vcombine.low %v886_v0, %v887_v1  ;;  %v902_v13 = vunpack.c.l.bf16 %v886_v0  ;;  %v903_v15 = vunpack.c.l.bf16 %v887_v1  ;;  %v888_v16 = vmul.bf16 %v872_v10, %v856_v7  ;;  %1840 = vmatpush3.bf16.msra.mxu1 %v1914_v25 }
  0xfc   : > { %920 = vadd.xlane.f32.xlu0 %v919_v27  ;;  %923 = vadd.xlane.f32.xlu1 %v922_v47  ;;  %v937_v12 = vsel %vm906_vm2, %v900_v3, 0.0  ;;  %v940_v14 = vsel %vm906_vm2, %v901_v5, 0.0  ;;  %v889_v17 = vmul.bf16 %v873_v11, %v857_v9 }
  0xfd   : > { %1824 = vmatmul.mubr.msk.bf16.vlgmr.msra.gmra.mxu0 %vm906_vm2, %v1711_v29  ;;  %v943_v18 = vsel %vm906_vm2, %v902_v13, 0.0  ;;  %v904_v19 = vunpack.c.l.bf16 %v888_v16  ;;  %v946_v20 = vsel %vm906_vm2, %v903_v15, 0.0  ;;  %1841 = vmatprep.subr.bf16.mxu1 %v1915_v26 }
  0xfe   : > { %1827 = vmatprep.mubr.msk.bf16.mxu0 %vm906_vm2, %v1712_v34  ;;  %v905_v21 = vunpack.c.l.bf16 %v889_v17  ;;  %v1717_v22 = vcombine.low %v888_v16, %v889_v17 }
  0xff   : > { %v949_v23 = vsel %vm906_vm2, %v904_v19, 0.0  ;;  %1842 = vmatpush3.bf16.msra.mxu1 %v1915_v26 }
 0x100   : > { %926 = vadd.xlane.f32.xlu0 %v925_v58  ;;  %929 = vadd.xlane.f32.xlu1 %v928_v60  ;;  %v952_v24 = vsel %vm906_vm2, %v905_v21, 0.0 }
 0x104   : > { %932 = vadd.xlane.f32.xlu0 %v931_v2  ;;  %935 = vadd.xlane.f32.xlu1 %v934_v4 }
 0x105   : > { %1828 = vmatmul.mubr.msk.bf16.gmra.mxu0 %vm906_vm2, %v1713_v49 }
 0x106   : > { %1831 = vmatprep.mubr.msk.bf16.mxu0 %vm906_vm2, %v1714_v38 }
 0x108   : > { %938 = vadd.xlane.f32.xlu0 %v937_v12  ;;  %941 = vadd.xlane.f32.xlu1 %v940_v14 }
 0x10c   : > { %944 = vadd.xlane.f32.xlu0 %v943_v18  ;;  %947 = vadd.xlane.f32.xlu1 %v946_v20 }
 0x10d   : > { %1832 = vmatmul.mubr.msk.bf16.gmra.mxu0 %vm906_vm2, %v1715_v6 }
 0x10e   : > { %1835 = vmatprep.mubr.msk.bf16.mxu0 %vm906_vm2, %v1716_v8 }
 0x110   : > { %950 = vadd.xlane.f32.xlu0 %v949_v23  ;;  %953 = vadd.xlane.f32.xlu1 %v952_v24 }
 0x115   : > { %1836 = vmatmul.mubr.msk.bf16.gmra.mxu0 %vm906_vm2, %v1717_v22 }
 0x17d   : > { %v915_v28 = vpop.xlane.xlu1 %914  ;;  %v909_v29 = vpop.xlane.xlu0 %908 }
 0x17e   : > { %v955_v35 = vmax.f32 %v909_v29, 1.0  ;;  %v957_v40 = vmax.f32 %v915_v28, 1.0 }
 0x180   : > { %1916 = vrcp.f32 %v955_v35 }
 0x181   : > { %v918_v30 = vpop.xlane.xlu1 %917  ;;  %v912_v31 = vpop.xlane.xlu0 %911 }
 0x182   : > { %v958_v37 = vmax.f32 %v918_v30, 1.0  ;;  %v956_v39 = vmax.f32 %v912_v31, 1.0 }
 0x184   : > { %1918 = vrcp.f32 %v958_v37 }
 0x185   : > { %v924_v32 = vpop.xlane.xlu1 %923  ;;  %v921_v33 = vpop.xlane.xlu0 %920  ;;  %1920 = vrcp.f32 %v956_v39 }
 0x186   : > { %1922 = vrcp.f32 %v957_v40  ;;  %v959_v44 = vmax.f32 %v921_v33, 1.0  ;;  %v960_v46 = vmax.f32 %v924_v32, 1.0 }
 0x189   : > { %v930_v34 = vpop.xlane.xlu1 %929  ;;  %v927_v36 = vpop.xlane.xlu0 %926 }
 0x18a   : > { %v962_v43 = vmax.f32 %v930_v34, 1.0  ;;  %v961_v27 = vmax.f32 %v927_v36, 1.0 }
 0x18c   : > { %1924 = vrcp.f32 %v962_v43 }
 0x18d   : > { %v936_v41 = vpop.xlane.xlu1 %935  ;;  %v933_v42 = vpop.xlane.xlu0 %932  ;;  %1926 = vrcp.f32 %v959_v44 }
 0x18e   : > { %1928 = vrcp.f32 %v961_v27  ;;  %v1917_v50 = vpop.eup %1916  ;;  %v963_v53 = vmax.f32 %v933_v42, 1.0  ;;  %v964_v59 = vmax.f32 %v936_v41, 1.0 }
 0x18f   : > { %1930 = vrcp.f32 %v960_v46 }
 0x191   : > { %v942_v45 = vpop.xlane.xlu1 %941  ;;  %v939_v47 = vpop.xlane.xlu0 %938 }
 0x192   : > { %v966_v52 = vmax.f32 %v942_v45, 1.0  ;;  %v1919_v38 = vpop.eup %1918  ;;  %v965_v56 = vmax.f32 %v939_v47, 1.0 }
 0x193   : > { %v1921_v55 = vpop.eup %1920 }
 0x194   : > { %v1923_v58 = vpop.eup %1922  ;;  %1932 = vrcp.f32 %v966_v52  ;;  %v1198_v52 = vld [vmem:[#allocation2 + $0x58] sm:$0xff] }
 0x195   : > { %v948_v49 = vpop.xlane.xlu1 %947  ;;  %v945_v54 = vpop.xlane.xlu0 %944  ;;  %1934 = vrcp.f32 %v963_v53  ;;  %v1196_v53 = vld [vmem:[#allocation2 + $0x30] sm:$0xff] }
 0x196   : > { %1936 = vrcp.f32 %v965_v56  ;;  %v967_v9 = vmax.f32 %v945_v54, 1.0  ;;  %v968_v14 = vmax.f32 %v948_v49, 1.0  ;;  %v1199_v56 = vld [vmem:[#allocation2 + $0x18] sm:$0xff] }
 0x197   : > { %1938 = vrcp.f32 %v964_v59  ;;  %v1197_v59 = vld [vmem:[#allocation2] sm:$0xff] }
 0x199   : > { %v954_v0 = vpop.xlane.xlu1 %953  ;;  %v951_v3 = vpop.xlane.xlu0 %950 }
 0x19a   : > { %v970_v7 = vmax.f32 %v954_v0, 1.0  ;;  %v1925_v8 = vpop.eup %1924  ;;  %v969_v11 = vmax.f32 %v951_v3, 1.0 }
 0x19b   : > { %v1927_v10 = vpop.eup %1926 }
 0x19c   : > { %v1929_v13 = vpop.eup %1928  ;;  %1940 = vrcp.f32 %v970_v7  ;;  %v1201_v7 = vld [vmem:[#allocation2 + $0x68] sm:$0xff] }
 0x19d   : > { %v1931_v15 = vpop.eup %1930  ;;  %1942 = vrcp.f32 %v967_v9 }
 0x19e   : > { %1944 = vrcp.f32 %v969_v11 }
 0x19f   : > { %1946 = vrcp.f32 %v968_v14 }
 0x1a1   : > { %v1933_v25 = vpop.eup %1932 }
 0x1a2   : > { %v1935_v26 = vpop.eup %1934 }
 0x1a3   : > { %v1937_v29 = vpop.eup %1936 }
 0x1a4   : > { %v1939_v30 = vpop.eup %1938 }
 0x1a9   : > { %v1941_v41 = vpop.eup %1940 }
 0x1aa   : > { %v1943_v42 = vpop.eup %1942 }
 0x1ab   : > { %v1945_v44 = vpop.eup %1944 }
 0x1ac   : > { %v1947_v45 = vpop.eup %1946 }
 0x1bd   : > { %v1825_v48 = vpop.f32.mrf.mxu0 }
 0x1be   : > { %v1182_v1 = vmul.f32 %v1923_v58, %v1825_v48 }
 0x1bf   : > { %v1101_v51 = vpop.f32.mrf.mxu0 }
 0x1c0   : > { %v1180_v62 = vmul.f32 %v1917_v50, %v1101_v51 }
 0x1c1   : > { %v1826_v57 = vpop.f32.mrf.mxu0 }
 0x1c2   : > { %v1183_v60 = vmul.f32 %v1919_v38, %v1826_v57 }
 0x1c3   : > { %v1104_v61 = vpop.f32.mrf.mxu0 }
 0x1c4   : > { %v1181_v63 = vmul.f32 %v1921_v55, %v1104_v61  ;;  %v1213_v5 = vpack.c.bf16 %v1183_v60, %v1182_v1  ;;  %v1200_v1 = vld [vmem:[#allocation2 + $0x50] sm:$0xff] }
 0x1c5   : > { %v1829_v2 = vpop.f32.mrf.mxu0 }
 0x1c6   : > { %v1212_v4 = vpack.c.bf16 %v1181_v63, %v1180_v62  ;;  %v1186_v20 = vmul.f32 %v1929_v13, %v1829_v2  ;;  %v1202_v62 = vld [vmem:[#allocation2 + $0x8] sm:$0xff]  ;;  %v1204_v13 = vld [vmem:[#allocation2 + $0x40] sm:$0xff] }
 0x1c7   : > { %v1117_v6 = vpop.f32.mrf.mxu0 }
 0x1c8   : > { %1843 = vmatprep.mubr.msk.bf16.mxu1 %vm1236_vm3, %v1212_v4  ;;  %v1184_v18 = vmul.f32 %v1927_v10, %v1117_v6  ;;  %v1203_v4 = vld [vmem:[#allocation2 + $0x48] sm:$0xff]  ;;  %v1206_v10 = vld [vmem:[#allocation2 + $0x10] sm:$0xff] }
 0x1c9   : > { %v1830_v12 = vpop.f32.mrf.mxu0  ;;  %1844 = vmatmul.mubr.msk.bf16.vlgmr.msra.gmra.mxu1 %vm1236_vm3, %v1213_v5 }
 0x1ca   : > { %v1187_v16 = vmul.f32 %v1925_v8, %v1830_v12 }
 0x1cb   : > { %v1120_v17 = vpop.f32.mrf.mxu0 }
 0x1cc   : > { %v1185_v19 = vmul.f32 %v1931_v15, %v1120_v17  ;;  %v1215_v23 = vpack.c.bf16 %v1187_v16, %v1186_v20  ;;  %v1207_v16 = vld [vmem:[#allocation2 + $0x38] sm:$0xff] }
 0x1cd   : > { %v1833_v21 = vpop.f32.mrf.mxu0 }
 0x1ce   : > { %v1214_v22 = vpack.c.bf16 %v1185_v19, %v1184_v18  ;;  %v1190_v35 = vmul.f32 %v1937_v29, %v1833_v21  ;;  %v1205_v19 = vld [vmem:[#allocation2 + $0x20] sm:$0xff]  ;;  %v1211_v29 = vld [vmem:[#allocation2 + $0x28] sm:$0xff] }
 0x1cf   : > { %v1133_v24 = vpop.f32.mrf.mxu0 }
 0x1d0   : > { %1847 = vmatprep.mubr.msk.bf16.mxu1 %vm1236_vm3, %v1214_v22  ;;  %v1188_v33 = vmul.f32 %v1935_v26, %v1133_v24  ;;  %v1210_v22 = vld [vmem:[#allocation2 + $0x78] sm:$0xff] }
 0x1d1   : > { %v1834_v28 = vpop.f32.mrf.mxu0  ;;  %1848 = vmatmul.mubr.msk.bf16.gmra.mxu1 %vm1236_vm3, %v1215_v23 }
 0x1d2   : > { %v1191_v31 = vmul.f32 %v1933_v25, %v1834_v28  ;;  %v1208_v25 = vld [vmem:[#allocation2 + $0x60] sm:$0xff] }
 0x1d3   : > { %v1136_v32 = vpop.f32.mrf.mxu0 }
 0x1d4   : > { %v1189_v34 = vmul.f32 %v1939_v30, %v1136_v32  ;;  %v1217_v39 = vpack.c.bf16 %v1191_v31, %v1190_v35  ;;  %v1209_v32 = vld [vmem:[#allocation2 + $0x70] sm:$0xff] }
 0x1d5   : > { %v1837_v36 = vpop.f32.mrf.mxu0 }
 0x1d6   : > { %v1216_v37 = vpack.c.bf16 %v1189_v34, %v1188_v33  ;;  %v1194_v49 = vmul.f32 %v1945_v44, %v1837_v36 }
 0x1d7   : > { %v1149_v40 = vpop.f32.mrf.mxu0 }
 0x1d8   : > { %1851 = vmatprep.mubr.msk.bf16.mxu1 %vm1236_vm3, %v1216_v37  ;;  %v1192_v47 = vmul.f32 %v1943_v42, %v1149_v40 }
 0x1d9   : > { %v1838_v43 = vpop.f32.mrf.mxu0  ;;  %1852 = vmatmul.mubr.msk.bf16.gmra.mxu1 %vm1236_vm3, %v1217_v39 }
 0x1da   : > { %v1195_v27 = vmul.f32 %v1941_v41, %v1838_v43 }
 0x1db   : > { %v1152_v46 = vpop.f32.mrf.mxu0 }
 0x1dc   : > { %v1193_v48 = vmul.f32 %v1947_v45, %v1152_v46  ;;  %v1219_v51 = vpack.c.bf16 %v1195_v27, %v1194_v49 }
 0x1de   : > { %v1218_v50 = vpack.c.bf16 %v1193_v48, %v1192_v47 }
 0x1e0   : > { %1855 = vmatprep.mubr.msk.bf16.mxu1 %vm1236_vm3, %v1218_v50 }
 0x1e1   : > { %1856 = vmatmul.mubr.msk.bf16.gmra.mxu1 %vm1236_vm3, %v1219_v51 }
 0x289   : > { %v1845_v38 = vpop.f32.mrf.mxu1 }
 0x28a   : > { %v1360_v54 = vadd.f32 %v1845_v38, %v1198_v52 }
 0x28b   : > { %v1295_v55 = vpop.f32.mrf.mxu1 }
 0x28c   : > { %1376 = vst [vmem:[#allocation2 + $0x58] sm:$0xff] %v1360_v54  ;;  %v1358_v57 = vadd.f32 %v1295_v55, %v1196_v53 }
 0x28d   : > { %v1846_v58 = vpop.f32.mrf.mxu1 }
 0x28e   : > { %1374 = vst [vmem:[#allocation2 + $0x30] sm:$0xff] %v1358_v57  ;;  %v1361_v60 = vadd.f32 %v1846_v58, %v1199_v56 }
 0x28f   : > { %v1298_v61 = vpop.f32.mrf.mxu1 }
 0x290   : > { %1377 = vst [vmem:[#allocation2 + $0x18] sm:$0xff] %v1361_v60  ;;  %v1359_v63 = vadd.f32 %v1298_v61, %v1197_v59 }
 0x291   : > { %v1849_v0 = vpop.f32.mrf.mxu1 }
 0x292   : > { %1375 = vst [vmem:[#allocation2] sm:$0xff] %v1359_v63  ;;  %v1364_v2 = vadd.f32 %v1849_v0, %v1202_v62 }
 0x293   : > { %v1311_v3 = vpop.f32.mrf.mxu1 }
 0x294   : > { %1380 = vst [vmem:[#allocation2 + $0x8] sm:$0xff] %v1364_v2  ;;  %v1362_v5 = vadd.f32 %v1311_v3, %v1200_v1 }
 0x295   : > { %v1850_v6 = vpop.f32.mrf.mxu1 }
 0x296   : > { %1378 = vst [vmem:[#allocation2 + $0x50] sm:$0xff] %v1362_v5  ;;  %v1365_v8 = vadd.f32 %v1850_v6, %v1203_v4 }
 0x297   : > { %v1314_v9 = vpop.f32.mrf.mxu1 }
 0x298   : > { %1381 = vst [vmem:[#allocation2 + $0x48] sm:$0xff] %v1365_v8  ;;  %v1363_v11 = vadd.f32 %v1314_v9, %v1201_v7 }
 0x299   : > { %v1853_v12 = vpop.f32.mrf.mxu1 }
 0x29a   : > { %1379 = vst [vmem:[#allocation2 + $0x68] sm:$0xff] %v1363_v11  ;;  %v1368_v14 = vadd.f32 %v1853_v12, %v1206_v10 }
 0x29b   : > { %v1327_v15 = vpop.f32.mrf.mxu1 }
 0x29c   : > { %1384 = vst [vmem:[#allocation2 + $0x10] sm:$0xff] %v1368_v14  ;;  %v1366_v17 = vadd.f32 %v1327_v15, %v1204_v13 }
 0x29d   : > { %v1854_v18 = vpop.f32.mrf.mxu1 }
 0x29e   : > { %1382 = vst [vmem:[#allocation2 + $0x40] sm:$0xff] %v1366_v17  ;;  %v1369_v20 = vadd.f32 %v1854_v18, %v1207_v16 }
 0x29f   : > { %v1330_v21 = vpop.f32.mrf.mxu1 }
 0x2a0   : > { %1385 = vst [vmem:[#allocation2 + $0x38] sm:$0xff] %v1369_v20  ;;  %v1367_v23 = vadd.f32 %v1330_v21, %v1205_v19 }
 0x2a1   : > { %v1857_v24 = vpop.f32.mrf.mxu1 }
 0x2a2   : > { %1383 = vst [vmem:[#allocation2 + $0x20] sm:$0xff] %v1367_v23  ;;  %v1372_v26 = vadd.f32 %v1857_v24, %v1210_v22 }
 0x2a3   : > { %v1343_v28 = vpop.f32.mrf.mxu1 }
 0x2a4   : > { %1388 = vst [vmem:[#allocation2 + $0x78] sm:$0xff] %v1372_v26  ;;  %v1370_v30 = vadd.f32 %v1343_v28, %v1208_v25 }
 0x2a5   : > { %v1858_v31 = vpop.f32.mrf.mxu1 }
 0x2a6   : > { %1386 = vst [vmem:[#allocation2 + $0x60] sm:$0xff] %v1370_v30  ;;  %v1373_v33 = vadd.f32 %v1858_v31, %v1211_v29  ;;  %1393 = sbr.rel (%p1740_p6) target bundleno = 874 (0x36a), region = 56 }
 0x2a7   : > { %v1346_v34 = vpop.f32.mrf.mxu1 }
 0x2a8   : > { %1389 = vst [vmem:[#allocation2 + $0x28] sm:$0xff] %v1373_v33  ;;  %v1371_v35 = vadd.f32 %v1346_v34, %v1209_v32 }
 0x2aa   : > { %1387 = vst [vmem:[#allocation2 + $0x70] sm:$0xff] %v1371_v35 }
 0x2ab   : > { %v1396_v36 = vld [vmem:[#allocation2 + $0x58] sm:$0xff]  ;;  %v1394_v37 = vld [vmem:[#allocation2 + $0x30] sm:$0xff]  ;;  %v1395_v43 = vld [vmem:[#allocation2] sm:$0xff] }
 0x2ac   : > { %v1397_v39 = vld [vmem:[#allocation2 + $0x18] sm:$0xff]  ;;  %v2313_v40 = vmax.f32 %v1396_v36, 0.0  ;;  %v2315_v41 = vmax.f32 %v1394_v37, 0.0  ;;  %v2319_v44 = vmax.f32 %v1395_v43, 0.0  ;;  %v1399_v45 = vld [vmem:[#allocation2 + $0x68] sm:$0xff]  ;;  %v1398_v27 = vld [vmem:[#allocation2 + $0x50] sm:$0xff] }
 0x2ad   : > { %v2317_v42 = vmax.f32 %v1397_v39, 0.0  ;;  %v2329_v50 = vmax.f32 %v1399_v45, 0.0  ;;  %v2331_v51 = vmax.f32 %v1398_v27, 0.0  ;;  %v1401_v52 = vld [vmem:[#allocation2 + $0x48] sm:$0xff]  ;;  %v1403_v57 = vld [vmem:[#allocation2 + $0x20] sm:$0xff]  ;;  %v1405_v63 = vld [vmem:[#allocation2 + $0x38] sm:$0xff] }
 0x2ae   : > { %v1428_v46 = vmul.f32 %v2313_v40, %v2313_v40  ;;  %v1426_v47 = vmul.f32 %v2315_v41, %v2315_v41  ;;  %v1427_v49 = vmul.f32 %v2319_v44, %v2319_v44  ;;  %v1400_v38 = vld [vmem:[#allocation2 + $0x8] sm:$0xff]  ;;  %v2337_v55 = vmax.f32 %v1401_v52, 0.0  ;;  %v1402_v58 = vld [vmem:[#allocation2 + $0x40] sm:$0xff]  ;;  %v1404_v0 = vld [vmem:[#allocation2 + $0x10] sm:$0xff] }
 0x2af   : > { %v1429_v48 = vmul.f32 %v2317_v42, %v2317_v42  ;;  %v1431_v53 = vmul.f32 %v2329_v50, %v2329_v50  ;;  %v1430_v54 = vmul.f32 %v2331_v51, %v2331_v51  ;;  %v2339_v56 = vmax.f32 %v1400_v38, 0.0  ;;  %v1406_v6 = vld [vmem:[#allocation2 + $0x60] sm:$0xff]  ;;  %v1409_v11 = vld [vmem:[#allocation2 + $0x28] sm:$0xff]  ;;  %v1408_v12 = vld [vmem:[#allocation2 + $0x78] sm:$0xff] }
 0x2b0   : > { %1446 = vadd.xlane.f32.xlu1 %v1428_v46  ;;  %1442 = vadd.xlane.f32.xlu0 %v1426_v47  ;;  %v1433_v59 = vmul.f32 %v2337_v55, %v2337_v55  ;;  %v2345_v61 = vmax.f32 %v1403_v57, 0.0  ;;  %v2347_v62 = vmax.f32 %v1402_v58, 0.0  ;;  %v2353_v3 = vmax.f32 %v1405_v63, 0.0 }
 0x2b1   : > { %v1432_v60 = vmul.f32 %v2339_v56, %v2339_v56  ;;  %v2355_v4 = vmax.f32 %v1404_v0, 0.0  ;;  %v1407_v5 = vld [vmem:[#allocation2 + $0x70] sm:$0xff]  ;;  %v2363_v10 = vmax.f32 %v1406_v6, 0.0  ;;  %v2369_v15 = vmax.f32 %v1409_v11, 0.0 }
 0x2b2   : > { %v1435_v1 = vmul.f32 %v2345_v61, %v2345_v61  ;;  %v1434_v2 = vmul.f32 %v2347_v62, %v2347_v62  ;;  %v1437_v7 = vmul.f32 %v2353_v3, %v2353_v3  ;;  %v2361_v9 = vmax.f32 %v1407_v5, 0.0 }
 0x2b3   : > { %v1436_v8 = vmul.f32 %v2355_v4, %v2355_v4  ;;  %v1438_v14 = vmul.f32 %v2363_v10, %v2363_v10  ;;  %v2371_v16 = vmax.f32 %v1408_v12, 0.0  ;;  %v1441_v17 = vmul.f32 %v2369_v15, %v2369_v15 }
 0x2b4   : > { %1448 = vadd.xlane.f32.xlu1 %v1429_v48  ;;  %1444 = vadd.xlane.f32.xlu0 %v1427_v49  ;;  %v1439_v13 = vmul.f32 %v2361_v9, %v2361_v9 }
 0x2b5   : > { %v1440_v18 = vmul.f32 %v2371_v16, %v2371_v16 }
 0x2b8   : > { %1452 = vadd.xlane.f32.xlu1 %v1431_v53  ;;  %1450 = vadd.xlane.f32.xlu0 %v1430_v54 }
 0x2bc   : > { %1456 = vadd.xlane.f32.xlu1 %v1433_v59  ;;  %1454 = vadd.xlane.f32.xlu0 %v1432_v60 }
 0x2c0   : > { %1460 = vadd.xlane.f32.xlu1 %v1435_v1  ;;  %1458 = vadd.xlane.f32.xlu0 %v1434_v2 }
 0x2c4   : > { %1464 = vadd.xlane.f32.xlu1 %v1437_v7  ;;  %1462 = vadd.xlane.f32.xlu0 %v1436_v8 }
 0x2c8   : > { %1468 = vadd.xlane.f32.xlu1 %v1439_v13  ;;  %1466 = vadd.xlane.f32.xlu0 %v1438_v14 }
 0x2cc   : > { %1472 = vadd.xlane.f32.xlu1 %v1441_v17  ;;  %1470 = vadd.xlane.f32.xlu0 %v1440_v18 }
 0x339   : > { %v1447_v19 = vpop.xlane.xlu1 %1446  ;;  %v1443_v20 = vpop.xlane.xlu0 %1442 }
 0x33a   : > { %v1476_v21 = vmax.f32 %v1447_v19, 1e-24  ;;  %v1474_v22 = vmax.f32 %v1443_v20, 1e-24 }
 0x33c   : > { %1948 = vrsqrt.f32 %v1476_v21 }
 0x33d   : > { %1950 = vrsqrt.f32 %v1474_v22  ;;  %v1449_v23 = vpop.xlane.xlu1 %1448  ;;  %v1445_v24 = vpop.xlane.xlu0 %1444 }
 0x33e   : > { %v1477_v25 = vmax.f32 %v1449_v23, 1e-24  ;;  %v1475_v26 = vmax.f32 %v1445_v24, 1e-24 }
 0x340   : > { %1952 = vrsqrt.f32 %v1477_v25 }
 0x341   : > { %1954 = vrsqrt.f32 %v1475_v26  ;;  %v1453_v28 = vpop.xlane.xlu1 %1452  ;;  %v1451_v29 = vpop.xlane.xlu0 %1450 }
 0x342   : > { %v1479_v30 = vmax.f32 %v1453_v28, 1e-24  ;;  %v1478_v31 = vmax.f32 %v1451_v29, 1e-24 }
 0x344   : > { %1956 = vrsqrt.f32 %v1479_v30 }
 0x345   : > { %1958 = vrsqrt.f32 %v1478_v31  ;;  %v1457_v32 = vpop.xlane.xlu1 %1456  ;;  %v1455_v33 = vpop.xlane.xlu0 %1454 }
 0x346   : > { %v1481_v34 = vmax.f32 %v1457_v32, 1e-24  ;;  %v1480_v35 = vmax.f32 %v1455_v33, 1e-24 }
 0x348   : > { %1960 = vrsqrt.f32 %v1481_v34 }
 0x349   : > { %v1949_v36 = vpop.eup %1948  ;;  %1962 = vrsqrt.f32 %v1480_v35  ;;  %v1461_v37 = vpop.xlane.xlu1 %1460 }
 0x34a   : > { %v1459_v39 = vpop.xlane.xlu0 %1458  ;;  %v1951_v43 = vpop.eup %1950  ;;  %v1508_v45 = vmul.f32 %v1949_v36, %v2313_v40  ;;  %v1483_v27 = vmax.f32 %v1461_v37, 1e-24 }
 0x34b   : > { %v1482_v46 = vmax.f32 %v1459_v39, 1e-24  ;;  %v1506_v47 = vmul.f32 %v1951_v43, %v2315_v41 }
 0x34c   : > { %1524 = vst [vmem:[#allocation4 + $0x10] sm:$0xff] %v1508_v45  ;;  %1964 = vrsqrt.f32 %v1483_v27 }
 0x34d   : > { %v1953_v48 = vpop.eup %1952  ;;  %1522 = vst [vmem:[#allocation4] sm:$0xff] %v1506_v47  ;;  %1966 = vrsqrt.f32 %v1482_v46  ;;  %v1465_v49 = vpop.xlane.xlu1 %1464 }
 0x34e   : > { %v1463_v52 = vpop.xlane.xlu0 %1462  ;;  %v1955_v38 = vpop.eup %1954  ;;  %v1509_v53 = vmul.f32 %v1953_v48, %v2317_v42  ;;  %v1485_v54 = vmax.f32 %v1465_v49, 1e-24 }
 0x34f   : > { %v1484_v57 = vmax.f32 %v1463_v52, 1e-24  ;;  %v1507_v58 = vmul.f32 %v1955_v38, %v2319_v44 }
 0x350   : > { %1525 = vst [vmem:[#allocation4 + $0x18] sm:$0xff] %v1509_v53  ;;  %1968 = vrsqrt.f32 %v1485_v54 }
 0x351   : > { %v1957_v40 = vpop.eup %1956  ;;  %1523 = vst [vmem:[#allocation4 + $0x8] sm:$0xff] %v1507_v58  ;;  %1970 = vrsqrt.f32 %v1484_v57  ;;  %v1469_v41 = vpop.xlane.xlu1 %1468 }
 0x352   : > { %v1467_v59 = vpop.xlane.xlu0 %1466  ;;  %v1959_v60 = vpop.eup %1958  ;;  %v1511_v63 = vmul.f32 %v1957_v40, %v2329_v50  ;;  %v1487_v0 = vmax.f32 %v1469_v41, 1e-24 }
 0x353   : > { %v1486_v1 = vmax.f32 %v1467_v59, 1e-24  ;;  %v1510_v2 = vmul.f32 %v1959_v60, %v2331_v51 }
 0x354   : > { %1527 = vst [vmem:[#allocation4 + $0x28] sm:$0xff] %v1511_v63  ;;  %1972 = vrsqrt.f32 %v1487_v0 }
 0x355   : > { %v1961_v42 = vpop.eup %1960  ;;  %1526 = vst [vmem:[#allocation4 + $0x20] sm:$0xff] %v1510_v2  ;;  %1974 = vrsqrt.f32 %v1486_v1  ;;  %v1473_v44 = vpop.xlane.xlu1 %1472 }
 0x356   : > { %v1471_v5 = vpop.xlane.xlu0 %1470  ;;  %v1963_v6 = vpop.eup %1962  ;;  %v1513_v7 = vmul.f32 %v1961_v42, %v2337_v55  ;;  %v1489_v8 = vmax.f32 %v1473_v44, 1e-24 }
 0x357   : > { %v1488_v11 = vmax.f32 %v1471_v5, 1e-24  ;;  %v1512_v12 = vmul.f32 %v1963_v6, %v2339_v56 }
 0x358   : > { %1529 = vst [vmem:[#allocation4 + $0x38] sm:$0xff] %v1513_v7  ;;  %1976 = vrsqrt.f32 %v1489_v8 }
 0x359   : > { %v1965_v50 = vpop.eup %1964  ;;  %1528 = vst [vmem:[#allocation4 + $0x30] sm:$0xff] %v1512_v12  ;;  %1978 = vrsqrt.f32 %v1488_v11 }
 0x35a   : > { %v1967_v51 = vpop.eup %1966  ;;  %v1515_v13 = vmul.f32 %v1965_v50, %v2345_v61 }
 0x35b   : > { %v1514_v14 = vmul.f32 %v1967_v51, %v2347_v62 }
 0x35c   : > { %1531 = vst [vmem:[#allocation4 + $0x48] sm:$0xff] %v1515_v13 }
 0x35d   : > { %v1969_v17 = vpop.eup %1968  ;;  %1530 = vst [vmem:[#allocation4 + $0x40] sm:$0xff] %v1514_v14 }
 0x35e   : > { %v1971_v18 = vpop.eup %1970  ;;  %v1517_v55 = vmul.f32 %v1969_v17, %v2353_v3 }
 0x35f   : > { %v1516_v19 = vmul.f32 %v1971_v18, %v2355_v4 }
 0x360   : > { %1533 = vst [vmem:[#allocation4 + $0x58] sm:$0xff] %v1517_v55 }
 0x361   : > { %v1973_v56 = vpop.eup %1972  ;;  %1532 = vst [vmem:[#allocation4 + $0x50] sm:$0xff] %v1516_v19 }
 0x362   : > { %v1975_v20 = vpop.eup %1974  ;;  %v1519_v21 = vmul.f32 %v1973_v56, %v2361_v9 }
 0x363   : > { %v1518_v22 = vmul.f32 %v1975_v20, %v2363_v10 }
 0x364   : > { %1535 = vst [vmem:[#allocation4 + $0x68] sm:$0xff] %v1519_v21 }
 0x365   : > { %v1977_v61 = vpop.eup %1976  ;;  %1534 = vst [vmem:[#allocation4 + $0x60] sm:$0xff] %v1518_v22 }
 0x366   : > { %v1979_v62 = vpop.eup %1978  ;;  %v1521_v23 = vmul.f32 %v1977_v61, %v2369_v15 }
 0x367   : > { %v1520_v24 = vmul.f32 %v1979_v62, %v2371_v16 }
 0x368   : > { %1537 = vst [vmem:[#allocation4 + $0x78] sm:$0xff] %v1521_v23 }
 0x369   : > { %1536 = vst [vmem:[#allocation4 + $0x70] sm:$0xff] %v1520_v24 }
 0x36a PF: > { %p2395_p7 = scmp.eq.s32.totalorder %s1648_s27, 2  ;;  %s2034_s11 = smov [#allocation4]  }
 0x36b   : > { %s1547_s14 = sshll.u32 %s2034_s11, 4  ;;  %s1548_s14 = int_to_ptr.vmem [resolvable:$true] %s1547_s14 }
 0x36c   : > { %s1980_s12 = scalar_lea.vmem %s1548_s14, 2048  ;;  %p1987_p11 = scmp.lt.s32.totalorder %s1548_s14, %s1548_s14 }
 0x36d   : > { %p1981_p8 = scmp.ne.s32.totalorder %s1548_s14, %s1980_s12  ;;  %p1988_p12 = scmp.lt.s32.totalorder %s1980_s12, %s1980_s12 }
 0x36f   : > { %p1982_p9 = pnand %p1981_p8, %p2395_p7  ;;  %p1989_p13 = por %p1988_p12, %p1987_p11 }
 0x371   : > { %p1983_p10 = pneg %p1982_p9 }
 0x373   : > { %p1990_p0 = pnand %p1989_p13, %p1983_p10 }
 0x375   : > { %1993 = shalt.err (!%p1990_p0)
}
 0x376   : > { %s2035_s13 = smov 128   ;;  %s2036_s27 = smov 8  }
 0x377   : > { %1864 = dma.vmem_to_hbm [thread:$0]  (%p2395_p7), %s1548_s14, 2048, %s2426_s7, [#allocation5], %s2035_s13, %s2035_s13, %s2036_s27  }
 0x378   : > { %2017 = dma.done.wait (%p2395_p7), [#allocation5], 2048  }
 0x379   : > { %2019 = vsyncadd (%p2395_p7), [#allocation5], 4294965248 }
 0x37a PF: > { %s18_s26 = sadd.s32 1, %s2030_s26   ;;  %s2428_s24 = smov %s2026_s25 }
 0x37b   : > { %p15_p1 = scmp.ge.s32.totalorder %s18_s26, 5   ;;  %s2429_s25 = smov %s2431_s28 }
 0x37d   :  { %17 = sbr.rel (!%p15_p1) target bundleno = 2 (0x2), region = 93 }
 0x382   :  { %1563 = vsyncpa [#allocation5], 1 }
 0x383   :  { %1565 = vsyncpa [#allocation5 + $0x1], 1 }

// kernel: tpu_custom_call.1
= control target key start
LH: loop header
LB: loop body
LE: loop exit
PB: predicated region body
PF: predicated region fallthrough
CT: control target
= control target key end

     0   :  { %12 = vsyncpa [#allocation5], 0  ;;  %s2077_s24 = smov 0   ;;  %s2079_s25 = smov 0   ;;  %s2419_s0 = inlined_call_operand.vmem [shape: bf16[3,128,64], index: 0, kind: input, shape index: {}]   ;;  %s2420_s1 = inlined_call_operand.vmem [shape: bf16[64,32], index: 1, kind: input, shape index: {}]   ;;  %s2421_s2 = inlined_call_operand.vmem [shape: bf16[128,32], index: 2, kind: input, shape index: {}]   ;;  %s2422_s3 = inlined_call_operand.vmem [shape: f32[1,64], index: 3, kind: input, shape index: {}]   ;;  %s2423_s4 = inlined_call_operand.vmem [shape: f32[128,1], index: 4, kind: input, shape index: {}]   ;;  %s2424_s5 = inlined_call_operand.vmem [shape: bf16[32,128], index: 5, kind: input, shape index: {}]   ;;  %s2425_s6 = inlined_call_operand.vmem [shape: bf16[3,32,128], index: 6, kind: input, shape index: {}]   ;;  %s2426_s7 = inlined_call_operand.hbm [shape: f32[128,128], index: 7, kind: output, shape index: {}]  }
   0x1   :  { %s2081_s26 = smov 0  }
   0x2 LB: > { %s1648_s27 = sadd.s32 4294967295, %s2030_s26   ;;  %s27_s28 = sadd.s32 1, %s2026_s25  ;;  %s2030_s26 = sphi %s2081_s26, %s18_s26   ;;  %s2026_s25 = sphi %s2079_s25, %s2429_s25   ;;  %s2022_s24 = sphi %s2077_s24, %s2428_s24  }
   0x3   : > { %p28_p0 = scmp.ge.s32.totalorder %s27_s28, 3  ;;  %p1653_p1 = scmp.ge.s32.totalorder %s2030_s26, 1 }
   0x4   : > { %p289_p2 = scmp.lt.s32.totalorder %s2030_s26, 4 }
   0x5   : > { %s2431_s28 = smov (%p28_p0, %s27_s28), 0 }
   0x6   : > { %p290_p3 = pnand %p1653_p1, %p289_p2 }
   0x7   : > { %p336_p4 = scmp.lt.s32.totalorder (!%p290_p3), %s2022_s24, 2  ;;  %p1658_p5 = scmp.ne.s32.totalorder (!%p290_p3), %s2022_s24, 0 }
   0x8   : > { %293 = sbr.rel (%p290_p3) target bundleno = 890 (0x37a), region = 48 }
   0xd   : > { %s337_s29 = scalar_select %p336_p4, %s2022_s24, 2 }
   0xe   : > { %367 = sbr.rel (%p1658_p5) target bundleno = 236 (0xec), region = 52 }
   0xf   : > { %s1745_s30 = sshll.u32 %s337_s29, 6  ;;  %s1746_s8 = sshll.u32 %s337_s29, 4 }
  0x10   : > { %s2103_s11 = scalar_lea.vmem %s2419_s0, %s1745_s30  ;;  %s2108_s14 = scalar_lea.vmem %s2425_s6, %s1746_s8 }
  0x13   : > { %v1900_v0 = vld [vmem:[%s2424_s5 + $0x8] sm:$0xff]   ;;  %v1901_v1 = vld [vmem:[%s2424_s5] sm:$0xff]   ;;  %vm704_vm0 = vcmask 261120   ;;  %v1906_v6 = vld [vmem:[%s2421_s2 + $0x10] sm:$0xff]   ;;  %v2032_v7 = vmov 0   ;;  %vm615_vm3 = vcmask 519168  }
  0x14   : > { %1795 = vmatprep.subr.bf16.mxu0 %v1900_v0  ;;  %1859 = vmatprep.subr.bf16.mxu1 %v1900_v0  ;;  %v1902_v2 = vld [vmem:[%s2421_s2] sm:$0xff]   ;;  %v1904_v4 = vld [vmem:[%s2421_s2 + $0x8] sm:$0xff]   ;;  %v1907_v8 = vld [vmem:[%s2421_s2 + $0x30] sm:$0xff]   ;;  %v2033_v38 = vmov 0.0  }
  0x15   : > { %1796 = vmatpush3.bf16.msra.mxu0 %v1900_v0  ;;  %1861 = vmatpush3.bf16.msra.mxu1 %v1900_v0  ;;  %v1903_v3 = vld [vmem:[%s2421_s2 + $0x20] sm:$0xff]   ;;  %v1905_v5 = vld [vmem:[%s2421_s2 + $0x28] sm:$0xff]   ;;  %v371_v9 = vld [vmem:[%s2423_s4 + $0x10] sm:$0xff] }
  0x16   : > { %1797 = vmatprep.subr.bf16.mxu0 %v1901_v1  ;;  %1860 = vmatprep.subr.bf16.mxu1 %v1901_v1  ;;  %v369_v10 = vld [vmem:[%s2423_s4] sm:$0xff]  ;;  %v372_v11 = vld [vmem:[%s2423_s4 + $0x18] sm:$0xff]  ;;  %v370_v12 = vld [vmem:[%s2423_s4 + $0x8] sm:$0xff] }
  0x17   : > { %1799 = vmatprep.mubr.msk.bf16.mxu0 %vm704_vm0, %v1902_v2  ;;  %1807 = vmatprep.mubr.msk.bf16.mxu1 %vm704_vm0, %v1903_v3  ;;  %v1908_v13 = vld [vmem:[%s2421_s2 + $0x18] sm:$0xff]   ;;  %v374_v15 = vld [vmem:[%s2423_s4 + $0x28] sm:$0xff]  ;;  %v373_v16 = vld [vmem:[%s2423_s4 + $0x20] sm:$0xff] }
  0x18   : > { %1899 = vset.pattern.permute.xlu1 %v2032_v7  ;;  %1898 = vset.pattern.permute.xlu0 %v2032_v7  ;;  %v1909_v14 = vld [vmem:[%s2421_s2 + $0x38] sm:$0xff]   ;;  %v375_v18 = vld [vmem:[%s2423_s4 + $0x30] sm:$0xff]  ;;  %v378_v19 = vld [vmem:[%s2423_s4 + $0x48] sm:$0xff] }
  0x19   : > { %1798 = vmatpush3.bf16.msra.mxu0 %v1901_v1  ;;  %1862 = vmatpush3.bf16.msra.mxu1 %v1901_v1  ;;  %v376_v17 = vld [vmem:[%s2423_s4 + $0x38] sm:$0xff]  ;;  %v377_v20 = vld [vmem:[%s2423_s4 + $0x40] sm:$0xff]  ;;  %v379_v22 = vld [vmem:[%s2423_s4 + $0x50] sm:$0xff] }
  0x1a   : > { %403 = vperm.xlu1 %1899, %v371_v9   ;;  %393 = vperm.xlu0 %1898, %v369_v10   ;;  %v380_v21 = vld [vmem:[%s2423_s4 + $0x58] sm:$0xff]  ;;  %v382_v23 = vld [vmem:[%s2423_s4 + $0x68] sm:$0xff]  ;;  %v381_v24 = vld [vmem:[%s2423_s4 + $0x60] sm:$0xff] }
  0x1b   : > { %v384_v25 = vld [vmem:[%s2423_s4 + $0x78] sm:$0xff]  ;;  %v383_v26 = vld [vmem:[%s2423_s4 + $0x70] sm:$0xff]  ;;  %v2200_v27 = vld [vmem:[%s2422_s3] ss:$0 sm:$0xff] }
  0x1c   : > { %1800 = vmatmul.mubr.msk.bf16.vlgmr.msra.gmra.mxu0 %vm704_vm0, %v1904_v4  ;;  %1808 = vmatmul.mubr.msk.bf16.vlgmr.msra.gmra.mxu1 %vm704_vm0, %v1905_v5 }
  0x1d   : > { %1803 = vmatprep.mubr.msk.bf16.mxu0 %vm704_vm0, %v1906_v6  ;;  %1811 = vmatprep.mubr.msk.bf16.mxu1 %vm704_vm0, %v1907_v8 }
  0x1e   : > { %408 = vperm.xlu1 %1899, %v372_v11   ;;  %398 = vperm.xlu0 %1898, %v370_v12  }
  0x22   : > { %418 = vperm.xlu1 %1899, %v374_v15   ;;  %413 = vperm.xlu0 %1898, %v373_v16  }
  0x24   : > { %1804 = vmatmul.mubr.msk.bf16.gmra.mxu0 %vm704_vm0, %v1908_v13  ;;  %1812 = vmatmul.mubr.msk.bf16.gmra.mxu1 %vm704_vm0, %v1909_v14 }
  0x26   : > { %428 = vperm.xlu1 %1899, %v376_v17   ;;  %423 = vperm.xlu0 %1898, %v375_v18  }
  0x2a   : > { %438 = vperm.xlu1 %1899, %v378_v19   ;;  %433 = vperm.xlu0 %1898, %v377_v20  }
  0x2e   : > { %448 = vperm.xlu1 %1899, %v380_v21   ;;  %443 = vperm.xlu0 %1898, %v379_v22  }
  0x32   : > { %458 = vperm.xlu1 %1899, %v382_v23   ;;  %453 = vperm.xlu0 %1898, %v381_v24  }
  0x36   : > { %468 = vperm.xlu1 %1899, %v384_v25   ;;  %463 = vperm.xlu0 %1898, %v383_v26  }
  0x95   : > { %v404_v28 = vpop.permute.xlu1 %403  ;;  %v394_v29 = vpop.permute.xlu0 %393 }
  0x96   : > { %v473_v30 = vsub.f32 %v2200_v27, %v404_v28  ;;  %v471_v31 = vsub.f32 %v2200_v27, %v394_v29 }
  0x98   : > { %v489_v32 = vand.u32 2147483647, %v473_v30  ;;  %v487_v33 = vand.u32 2147483647, %v471_v31 }
  0x99   : > { %v409_v34 = vpop.permute.xlu1 %408  ;;  %v399_v35 = vpop.permute.xlu0 %398 }
  0x9a   : > { %vm505_vm1 = vcmp.le.f32.partialorder %v489_v32, 0.5  ;;  %vm503_vm2 = vcmp.le.f32.partialorder %v487_v33, 0.5  ;;  %v474_v36 = vsub.f32 %v2200_v27, %v409_v34  ;;  %v472_v37 = vsub.f32 %v2200_v27, %v399_v35 }
  0x9b   : > { %v1662_v39 = vsel %vm505_vm1, 1.0, %v2033_v38  ;;  %v1660_v40 = vsel %vm503_vm2, 1.0, %v2033_v38 }
  0x9c   : > { %v1749_v41 = vpack.c.bf16 %v1662_v39, %v1662_v39  ;;  %v1747_v42 = vpack.c.bf16 %v1660_v40, %v1660_v40  ;;  %v490_v43 = vand.u32 2147483647, %v474_v36  ;;  %v488_v44 = vand.u32 2147483647, %v472_v37 }
  0x9d   : > { %v419_v45 = vpop.permute.xlu1 %418  ;;  %v414_v46 = vpop.permute.xlu0 %413 }
  0x9e   : > { %618 = vst.msk [vmem:[#allocation3 + $0x8] sm:$0xf] %vm615_vm3, %v1749_v41  ;;  %616 = vst.msk [vmem:[#allocation3] sm:$0xf] %vm615_vm3, %v1747_v42  ;;  %vm506_vm4 = vcmp.le.f32.partialorder %v490_v43, 0.5  ;;  %vm504_vm5 = vcmp.le.f32.partialorder %v488_v44, 0.5  ;;  %v476_v47 = vsub.f32 %v2200_v27, %v419_v45  ;;  %v475_v48 = vsub.f32 %v2200_v27, %v414_v46 }
  0x9f   : > { %v1663_v49 = vsel %vm506_vm4, 1.0, %v2033_v38  ;;  %v1661_v50 = vsel %vm504_vm5, 1.0, %v2033_v38 }
  0xa0   : > { %v1750_v51 = vpack.c.bf16 %v1663_v49, %v1663_v49  ;;  %v1748_v52 = vpack.c.bf16 %v1661_v50, %v1661_v50  ;;  %v492_v53 = vand.u32 2147483647, %v476_v47  ;;  %v491_v54 = vand.u32 2147483647, %v475_v48 }
  0xa1   : > { %v429_v55 = vpop.permute.xlu1 %428  ;;  %v424_v56 = vpop.permute.xlu0 %423 }
  0xa2   : > { %619 = vst.msk [vmem:[#allocation3 + $0xc] sm:$0xf] %vm615_vm3, %v1750_v51  ;;  %617 = vst.msk [vmem:[#allocation3 + $0x4] sm:$0xf] %vm615_vm3, %v1748_v52  ;;  %vm508_vm6 = vcmp.le.f32.partialorder %v492_v53, 0.5  ;;  %vm507_vm7 = vcmp.le.f32.partialorder %v491_v54, 0.5  ;;  %v478_v57 = vsub.f32 %v2200_v27, %v429_v55  ;;  %v477_v58 = vsub.f32 %v2200_v27, %v424_v56 }
  0xa3   : > { %v1665_v59 = vsel %vm508_vm6, 1.0, %v2033_v38  ;;  %v1664_v60 = vsel %vm507_vm7, 1.0, %v2033_v38 }
  0xa4   : > { %v1752_v61 = vpack.c.bf16 %v1665_v59, %v1665_v59  ;;  %v1751_v62 = vpack.c.bf16 %v1664_v60, %v1664_v60  ;;  %v494_v63 = vand.u32 2147483647, %v478_v57  ;;  %v493_v0 = vand.u32 2147483647, %v477_v58 }
  0xa5   : > { %v439_v1 = vpop.permute.xlu1 %438  ;;  %v434_v2 = vpop.permute.xlu0 %433 }
  0xa6   : > { %621 = vst.msk [vmem:[#allocation3 + $0x14] sm:$0xf] %vm615_vm3, %v1752_v61  ;;  %620 = vst.msk [vmem:[#allocation3 + $0x10] sm:$0xf] %vm615_vm3, %v1751_v62  ;;  %vm510_vm8 = vcmp.le.f32.partialorder %v494_v63, 0.5  ;;  %vm509_vm9 = vcmp.le.f32.partialorder %v493_v0, 0.5  ;;  %v480_v3 = vsub.f32 %v2200_v27, %v439_v1  ;;  %v479_v4 = vsub.f32 %v2200_v27, %v434_v2 }
  0xa7   : > { %v1667_v5 = vsel %vm510_vm8, 1.0, %v2033_v38  ;;  %v1666_v6 = vsel %vm509_vm9, 1.0, %v2033_v38 }
  0xa8   : > { %v1754_v7 = vpack.c.bf16 %v1667_v5, %v1667_v5  ;;  %v1753_v8 = vpack.c.bf16 %v1666_v6, %v1666_v6  ;;  %v496_v9 = vand.u32 2147483647, %v480_v3  ;;  %v495_v10 = vand.u32 2147483647, %v479_v4 }
  0xa9   : > { %v449_v11 = vpop.permute.xlu1 %448  ;;  %v444_v12 = vpop.permute.xlu0 %443 }
  0xaa   : > { %623 = vst.msk [vmem:[#allocation3 + $0x1c] sm:$0xf] %vm615_vm3, %v1754_v7  ;;  %622 = vst.msk [vmem:[#allocation3 + $0x18] sm:$0xf] %vm615_vm3, %v1753_v8  ;;  %vm512_vm10 = vcmp.le.f32.partialorder %v496_v9, 0.5  ;;  %vm511_vm11 = vcmp.le.f32.partialorder %v495_v10, 0.5  ;;  %v482_v13 = vsub.f32 %v2200_v27, %v449_v11  ;;  %v481_v14 = vsub.f32 %v2200_v27, %v444_v12 }
  0xab   : > { %v1669_v15 = vsel %vm512_vm10, 1.0, %v2033_v38  ;;  %v1668_v16 = vsel %vm511_vm11, 1.0, %v2033_v38 }
  0xac   : > { %v1756_v17 = vpack.c.bf16 %v1669_v15, %v1669_v15  ;;  %v1755_v18 = vpack.c.bf16 %v1668_v16, %v1668_v16  ;;  %v498_v19 = vand.u32 2147483647, %v482_v13  ;;  %v497_v20 = vand.u32 2147483647, %v481_v14 }
  0xad   : > { %v459_v21 = vpop.permute.xlu1 %458  ;;  %v454_v22 = vpop.permute.xlu0 %453 }
  0xae   : > { %625 = vst.msk [vmem:[#allocation3 + $0x24] sm:$0xf] %vm615_vm3, %v1756_v17  ;;  %624 = vst.msk [vmem:[#allocation3 + $0x20] sm:$0xf] %vm615_vm3, %v1755_v18  ;;  %vm514_vm12 = vcmp.le.f32.partialorder %v498_v19, 0.5  ;;  %vm513_vm13 = vcmp.le.f32.partialorder %v497_v20, 0.5  ;;  %v484_v23 = vsub.f32 %v2200_v27, %v459_v21  ;;  %v483_v24 = vsub.f32 %v2200_v27, %v454_v22 }
  0xaf   : > { %v1671_v25 = vsel %vm514_vm12, 1.0, %v2033_v38  ;;  %v1670_v26 = vsel %vm513_vm13, 1.0, %v2033_v38 }
  0xb0   : > { %v1758_v28 = vpack.c.bf16 %v1671_v25, %v1671_v25  ;;  %v1757_v29 = vpack.c.bf16 %v1670_v26, %v1670_v26  ;;  %v500_v30 = vand.u32 2147483647, %v484_v23  ;;  %v499_v31 = vand.u32 2147483647, %v483_v24 }
  0xb1   : > { %v469_v32 = vpop.permute.xlu1 %468  ;;  %v464_v33 = vpop.permute.xlu0 %463 }
  0xb2   : > { %627 = vst.msk [vmem:[#allocation3 + $0x2c] sm:$0xf] %vm615_vm3, %v1758_v28  ;;  %626 = vst.msk [vmem:[#allocation3 + $0x28] sm:$0xf] %vm615_vm3, %v1757_v29  ;;  %vm516_vm14 = vcmp.le.f32.partialorder %v500_v30, 0.5  ;;  %vm515_vm15 = vcmp.le.f32.partialorder %v499_v31, 0.5  ;;  %v486_v34 = vsub.f32 %v2200_v27, %v469_v32  ;;  %v485_v35 = vsub.f32 %v2200_v27, %v464_v33 }
  0xb3   : > { %v1673_v36 = vsel %vm516_vm14, 1.0, %v2033_v38  ;;  %v1672_v37 = vsel %vm515_vm15, 1.0, %v2033_v38 }
  0xb4   : > { %v1760_v39 = vpack.c.bf16 %v1673_v36, %v1673_v36  ;;  %v1759_v40 = vpack.c.bf16 %v1672_v37, %v1672_v37  ;;  %v502_v41 = vand.u32 2147483647, %v486_v34  ;;  %v501_v42 = vand.u32 2147483647, %v485_v35 }
  0xb6   : > { %629 = vst.msk [vmem:[#allocation3 + $0x34] sm:$0xf] %vm615_vm3, %v1760_v39  ;;  %628 = vst.msk [vmem:[#allocation3 + $0x30] sm:$0xf] %vm615_vm3, %v1759_v40  ;;  %vm518_vm0 = vcmp.le.f32.partialorder %v502_v41, 0.5  ;;  %vm517_vm1 = vcmp.le.f32.partialorder %v501_v42, 0.5 }
  0xb7   : > { %v1675_v43 = vsel %vm518_vm0, 1.0, %v2033_v38  ;;  %v1674_v44 = vsel %vm517_vm1, 1.0, %v2033_v38 }
  0xb8   : > { %v1762_v45 = vpack.c.bf16 %v1675_v43, %v1675_v43  ;;  %v1761_v27 = vpack.c.bf16 %v1674_v44, %v1674_v44 }
  0xba   : > { %631 = vst.msk [vmem:[#allocation3 + $0x3c] sm:$0xf] %vm615_vm3, %v1762_v45  ;;  %630 = vst.msk [vmem:[#allocation3 + $0x38] sm:$0xf] %vm615_vm3, %v1761_v27 }
  0xdc   : > { %v1801_v46 = vpop.f32.mrf.mxu0  ;;  %v1809_v47 = vpop.f32.mrf.mxu1 }
  0xdd   : > { %828 = vst [vmem:[#allocation2 + $0x58] sm:$0xff] %v1801_v46  ;;  %836 = vst [vmem:[#allocation2 + $0x10] sm:$0xff] %v1809_v47 }
  0xde   : > { %v763_v48 = vpop.f32.mrf.mxu0  ;;  %v795_v49 = vpop.f32.mrf.mxu1 }
  0xdf   : > { %826 = vst [vmem:[#allocation2 + $0x30] sm:$0xff] %v763_v48  ;;  %834 = vst [vmem:[#allocation2 + $0x40] sm:$0xff] %v795_v49 }
  0xe0   : > { %v1802_v50 = vpop.f32.mrf.mxu0  ;;  %v1810_v51 = vpop.f32.mrf.mxu1 }
  0xe1   : > { %829 = vst [vmem:[#allocation2 + $0x18] sm:$0xff] %v1802_v50  ;;  %837 = vst [vmem:[#allocation2 + $0x38] sm:$0xff] %v1810_v51 }
  0xe2   : > { %v766_v52 = vpop.f32.mrf.mxu0  ;;  %v798_v38 = vpop.f32.mrf.mxu1 }
  0xe3   : > { %827 = vst [vmem:[#allocation2] sm:$0xff] %v766_v52  ;;  %835 = vst [vmem:[#allocation2 + $0x20] sm:$0xff] %v798_v38 }
  0xe4   : > { %v1805_v53 = vpop.f32.mrf.mxu0  ;;  %v1813_v54 = vpop.f32.mrf.mxu1 }
  0xe5   : > { %832 = vst [vmem:[#allocation2 + $0x8] sm:$0xff] %v1805_v53  ;;  %840 = vst [vmem:[#allocation2 + $0x78] sm:$0xff] %v1813_v54 }
  0xe6   : > { %v779_v55 = vpop.f32.mrf.mxu0  ;;  %v811_v56 = vpop.f32.mrf.mxu1 }
  0xe7   : > { %830 = vst [vmem:[#allocation2 + $0x50] sm:$0xff] %v779_v55  ;;  %838 = vst [vmem:[#allocation2 + $0x60] sm:$0xff] %v811_v56 }
  0xe8   : > { %v1806_v57 = vpop.f32.mrf.mxu0  ;;  %v1814_v58 = vpop.f32.mrf.mxu1 }
  0xe9   : > { %833 = vst [vmem:[#allocation2 + $0x48] sm:$0xff] %v1806_v57  ;;  %841 = vst [vmem:[#allocation2 + $0x28] sm:$0xff] %v1814_v58 }
  0xea   : > { %v782_v59 = vpop.f32.mrf.mxu0  ;;  %v814_v60 = vpop.f32.mrf.mxu1 }
  0xeb   : > { %831 = vst [vmem:[#allocation2 + $0x68] sm:$0xff] %v782_v59  ;;  %839 = vst [vmem:[#allocation2 + $0x70] sm:$0xff] %v814_v60 }
  0xec PF: > { %v1910_v61 = vld [vmem:[%s2420_s1 + $0x18] sm:$0xff]   ;;  %v1911_v62 = vld [vmem:[%s2420_s1 + $0x10] sm:$0xff]   ;;  %v1912_v63 = vld [vmem:[%s2420_s1 + $0x8] sm:$0xff]   ;;  %vm906_vm2 = vcmask 523264   ;;  %vm1236_vm3 = vcmask 261120   ;;  %p1740_p6 = scmp.ne.s32.totalorder %s2022_s24, 2 }
  0xed   : > { %1815 = vmatprep.subr.bf16.mxu0 %v1910_v61  ;;  %v842_v0 = vld [vmem:[%s2103_s11] sm:$0xf]  ;;  %v843_v1 = vld [vmem:[%s2103_s11 + $0x4] sm:$0xf]  ;;  %v844_v5 = vld [vmem:[%s2103_s11 + $0x8] sm:$0xf] }
  0xee   : > { %1816 = vmatpush3.bf16.msra.mxu0 %v1910_v61  ;;  %v858_v2 = vld [vmem:[#allocation3] sm:$0xf]  ;;  %v859_v3 = vld [vmem:[#allocation3 + $0x4] sm:$0xf]  ;;  %v860_v8 = vld [vmem:[#allocation3 + $0x8] sm:$0xf] }
  0xef   : > { %1817 = vmatprep.subr.bf16.mxu0 %v1911_v62  ;;  %v874_v4 = vmul.bf16 %v858_v2, %v842_v0  ;;  %v1913_v6 = vld [vmem:[%s2420_s1] sm:$0xff]   ;;  %v875_v7 = vmul.bf16 %v859_v3, %v843_v1  ;;  %v845_v9 = vld [vmem:[%s2103_s11 + $0xc] sm:$0xf]  ;;  %v846_v11 = vld [vmem:[%s2103_s11 + $0x10] sm:$0xf]  ;;  %v876_v13 = vmul.bf16 %v860_v8, %v844_v5 }
  0xf0   : > { %v861_v10 = vld [vmem:[#allocation3 + $0xc] sm:$0xf]  ;;  %v847_v14 = vld [vmem:[%s2103_s11 + $0x14] sm:$0xf]  ;;  %v862_v15 = vld [vmem:[#allocation3 + $0x10] sm:$0xf] }
  0xf1   : > { %v1710_v12 = vcombine.low %v874_v4, %v875_v7  ;;  %v863_v16 = vld [vmem:[#allocation3 + $0x14] sm:$0xf]  ;;  %v877_v17 = vmul.bf16 %v861_v10, %v845_v9  ;;  %v890_v18 = vunpack.c.l.bf16 %v874_v4  ;;  %v892_v19 = vunpack.c.l.bf16 %v876_v13  ;;  %v848_v23 = vld [vmem:[%s2103_s11 + $0x18] sm:$0xf]  ;;  %v849_v24 = vld [vmem:[%s2103_s11 + $0x1c] sm:$0xf] }
  0xf2   : > { %1818 = vmatpush3.bf16.msra.mxu0 %v1911_v62  ;;  %v878_v20 = vmul.bf16 %v862_v15, %v846_v11  ;;  %v879_v21 = vmul.bf16 %v863_v16, %v847_v14  ;;  %v891_v22 = vunpack.c.l.bf16 %v875_v7  ;;  %v864_v25 = vld [vmem:[#allocation3 + $0x18] sm:$0xf]  ;;  %v865_v26 = vld [vmem:[#allocation3 + $0x1c] sm:$0xf]  ;;  %v850_v30 = vld [vmem:[%s2103_s11 + $0x20] sm:$0xf] }
  0xf3   : > { %1819 = vmatprep.subr.bf16.mxu0 %v1912_v63  ;;  %1823 = vmatprep.mubr.msk.bf16.mxu0 %vm906_vm2, %v1710_v12  ;;  %v893_v28 = vunpack.c.l.bf16 %v877_v17  ;;  %v1711_v29 = vcombine.low %v876_v13, %v877_v17  ;;  %v851_v31 = vld [vmem:[%s2103_s11 + $0x24] sm:$0xf]  ;;  %v907_v32 = vsel %vm906_vm2, %v890_v18, 0.0  ;;  %v913_v33 = vsel %vm906_vm2, %v892_v19, 0.0  ;;  %v866_v35 = vld [vmem:[#allocation3 + $0x20] sm:$0xf] }
  0xf4   : > { %v1712_v34 = vcombine.low %v878_v20, %v879_v21  ;;  %908 = vadd.xlane.f32.xlu0 %v907_v32  ;;  %v867_v36 = vld [vmem:[#allocation3 + $0x24] sm:$0xf]  ;;  %914 = vadd.xlane.f32.xlu1 %v913_v33  ;;  %v910_v37 = vsel %vm906_vm2, %v891_v22, 0.0  ;;  %v894_v39 = vunpack.c.l.bf16 %v878_v20  ;;  %v895_v41 = vunpack.c.l.bf16 %v879_v21  ;;  %v852_v50 = vld [vmem:[%s2103_s11 + $0x28] sm:$0xf] }
  0xf5   : > { %v916_v40 = vsel %vm906_vm2, %v893_v28, 0.0  ;;  %v880_v42 = vmul.bf16 %v864_v25, %v848_v23  ;;  %v881_v43 = vmul.bf16 %v865_v26, %v849_v24  ;;  %v882_v44 = vmul.bf16 %v866_v35, %v850_v30  ;;  %v853_v51 = vld [vmem:[%s2103_s11 + $0x2c] sm:$0xf]  ;;  %v868_v52 = vld [vmem:[#allocation3 + $0x28] sm:$0xf]  ;;  %v1915_v26 = vld [vmem:[%s2108_s14] sm:$0xff]  }
  0xf6   : > { %1820 = vmatpush3.bf16.msra.mxu0 %v1912_v63  ;;  %v883_v45 = vmul.bf16 %v867_v36, %v851_v31  ;;  %v919_v27 = vsel %vm906_vm2, %v894_v39, 0.0  ;;  %v922_v47 = vsel %vm906_vm2, %v895_v41, 0.0  ;;  %v869_v53 = vld [vmem:[#allocation3 + $0x2c] sm:$0xf]  ;;  %v854_v54 = vld [vmem:[%s2103_s11 + $0x30] sm:$0xf]  ;;  %v884_v62 = vmul.bf16 %v868_v52, %v852_v50 }
  0xf7   : > { %1821 = vmatprep.subr.bf16.mxu0 %v1913_v6  ;;  %v896_v46 = vunpack.c.l.bf16 %v880_v42  ;;  %v897_v48 = vunpack.c.l.bf16 %v881_v43  ;;  %v1713_v49 = vcombine.low %v880_v42, %v881_v43  ;;  %v855_v55 = vld [vmem:[%s2103_s11 + $0x34] sm:$0xf]  ;;  %v870_v56 = vld [vmem:[#allocation3 + $0x30] sm:$0xf]  ;;  %v898_v59 = vunpack.c.l.bf16 %v882_v44  ;;  %v856_v7 = vld [vmem:[%s2103_s11 + $0x38] sm:$0xf] }
  0xf8   : > { %911 = vadd.xlane.f32.xlu0 %v910_v37  ;;  %917 = vadd.xlane.f32.xlu1 %v916_v40  ;;  %v1714_v38 = vcombine.low %v882_v44, %v883_v45  ;;  %v871_v57 = vld [vmem:[#allocation3 + $0x34] sm:$0xf]  ;;  %v899_v61 = vunpack.c.l.bf16 %v883_v45  ;;  %v885_v63 = vmul.bf16 %v869_v53, %v853_v51  ;;  %v886_v0 = vmul.bf16 %v870_v56, %v854_v54  ;;  %v857_v9 = vld [vmem:[%s2103_s11 + $0x3c] sm:$0xf]  ;;  %v872_v10 = vld [vmem:[#allocation3 + $0x38] sm:$0xf] }
  0xf9   : > { %v925_v58 = vsel %vm906_vm2, %v896_v46, 0.0  ;;  %v928_v60 = vsel %vm906_vm2, %v897_v48, 0.0  ;;  %v887_v1 = vmul.bf16 %v871_v57, %v855_v55  ;;  %v931_v2 = vsel %vm906_vm2, %v898_v59, 0.0  ;;  %v873_v11 = vld [vmem:[#allocation3 + $0x3c] sm:$0xf]  ;;  %v1914_v25 = vld [vmem:[%s2108_s14 + $0x8] sm:$0xff]  }
  0xfa   : > { %1822 = vmatpush3.bf16.msra.mxu0 %v1913_v6  ;;  %v900_v3 = vunpack.c.l.bf16 %v884_v62  ;;  %v934_v4 = vsel %vm906_vm2, %v899_v61, 0.0  ;;  %v901_v5 = vunpack.c.l.bf16 %v885_v63  ;;  %v1715_v6 = vcombine.low %v884_v62, %v885_v63  ;;  %1839 = vmatprep.subr.bf16.mxu1 %v1914_v25 }
  0xfb   : > { %v1716_v8 = vcombine.low %v886_v0, %v887_v1  ;;  %v902_v13 = vunpack.c.l.bf16 %v886_v0  ;;  %v903_v15 = vunpack.c.l.bf16 %v887_v1  ;;  %v888_v16 = vmul.bf16 %v872_v10, %v856_v7  ;;  %1840 = vmatpush3.bf16.msra.mxu1 %v1914_v25 }
  0xfc   : > { %920 = vadd.xlane.f32.xlu0 %v919_v27  ;;  %923 = vadd.xlane.f32.xlu1 %v922_v47  ;;  %v937_v12 = vsel %vm906_vm2, %v900_v3, 0.0  ;;  %v940_v14 = vsel %vm906_vm2, %v901_v5, 0.0  ;;  %v889_v17 = vmul.bf16 %v873_v11, %v857_v9 }
  0xfd   : > { %1824 = vmatmul.mubr.msk.bf16.vlgmr.msra.gmra.mxu0 %vm906_vm2, %v1711_v29  ;;  %v943_v18 = vsel %vm906_vm2, %v902_v13, 0.0  ;;  %v904_v19 = vunpack.c.l.bf16 %v888_v16  ;;  %v946_v20 = vsel %vm906_vm2, %v903_v15, 0.0  ;;  %1841 = vmatprep.subr.bf16.mxu1 %v1915_v26 }
  0xfe   : > { %1827 = vmatprep.mubr.msk.bf16.mxu0 %vm906_vm2, %v1712_v34  ;;  %v905_v21 = vunpack.c.l.bf16 %v889_v17  ;;  %v1717_v22 = vcombine.low %v888_v16, %v889_v17 }
  0xff   : > { %v949_v23 = vsel %vm906_vm2, %v904_v19, 0.0  ;;  %1842 = vmatpush3.bf16.msra.mxu1 %v1915_v26 }
 0x100   : > { %926 = vadd.xlane.f32.xlu0 %v925_v58  ;;  %929 = vadd.xlane.f32.xlu1 %v928_v60  ;;  %v952_v24 = vsel %vm906_vm2, %v905_v21, 0.0 }
 0x104   : > { %932 = vadd.xlane.f32.xlu0 %v931_v2  ;;  %935 = vadd.xlane.f32.xlu1 %v934_v4 }
 0x105   : > { %1828 = vmatmul.mubr.msk.bf16.gmra.mxu0 %vm906_vm2, %v1713_v49 }
 0x106   : > { %1831 = vmatprep.mubr.msk.bf16.mxu0 %vm906_vm2, %v1714_v38 }
 0x108   : > { %938 = vadd.xlane.f32.xlu0 %v937_v12  ;;  %941 = vadd.xlane.f32.xlu1 %v940_v14 }
 0x10c   : > { %944 = vadd.xlane.f32.xlu0 %v943_v18  ;;  %947 = vadd.xlane.f32.xlu1 %v946_v20 }
 0x10d   : > { %1832 = vmatmul.mubr.msk.bf16.gmra.mxu0 %vm906_vm2, %v1715_v6 }
 0x10e   : > { %1835 = vmatprep.mubr.msk.bf16.mxu0 %vm906_vm2, %v1716_v8 }
 0x110   : > { %950 = vadd.xlane.f32.xlu0 %v949_v23  ;;  %953 = vadd.xlane.f32.xlu1 %v952_v24 }
 0x115   : > { %1836 = vmatmul.mubr.msk.bf16.gmra.mxu0 %vm906_vm2, %v1717_v22 }
 0x17d   : > { %v915_v28 = vpop.xlane.xlu1 %914  ;;  %v909_v29 = vpop.xlane.xlu0 %908 }
 0x17e   : > { %v955_v35 = vmax.f32 %v909_v29, 1.0  ;;  %v957_v40 = vmax.f32 %v915_v28, 1.0 }
 0x180   : > { %1916 = vrcp.f32 %v955_v35 }
 0x181   : > { %v918_v30 = vpop.xlane.xlu1 %917  ;;  %v912_v31 = vpop.xlane.xlu0 %911 }
 0x182   : > { %v958_v37 = vmax.f32 %v918_v30, 1.0  ;;  %v956_v39 = vmax.f32 %v912_v31, 1.0 }
 0x184   : > { %1918 = vrcp.f32 %v958_v37 }
 0x185   : > { %v924_v32 = vpop.xlane.xlu1 %923  ;;  %v921_v33 = vpop.xlane.xlu0 %920  ;;  %1920 = vrcp.f32 %v956_v39 }
 0x186   : > { %1922 = vrcp.f32 %v957_v40  ;;  %v959_v44 = vmax.f32 %v921_v33, 1.0  ;;  %v960_v46 = vmax.f32 %v924_v32, 1.0 }
 0x189   : > { %v930_v34 = vpop.xlane.xlu1 %929  ;;  %v927_v36 = vpop.xlane.xlu0 %926 }
 0x18a   : > { %v962_v43 = vmax.f32 %v930_v34, 1.0  ;;  %v961_v27 = vmax.f32 %v927_v36, 1.0 }
 0x18c   : > { %1924 = vrcp.f32 %v962_v43 }
 0x18d   : > { %v936_v41 = vpop.xlane.xlu1 %935  ;;  %v933_v42 = vpop.xlane.xlu0 %932  ;;  %1926 = vrcp.f32 %v959_v44 }
 0x18e   : > { %1928 = vrcp.f32 %v961_v27  ;;  %v1917_v50 = vpop.eup %1916  ;;  %v963_v53 = vmax.f32 %v933_v42, 1.0  ;;  %v964_v59 = vmax.f32 %v936_v41, 1.0 }
 0x18f   : > { %1930 = vrcp.f32 %v960_v46 }
 0x191   : > { %v942_v45 = vpop.xlane.xlu1 %941  ;;  %v939_v47 = vpop.xlane.xlu0 %938 }
 0x192   : > { %v966_v52 = vmax.f32 %v942_v45, 1.0  ;;  %v1919_v38 = vpop.eup %1918  ;;  %v965_v56 = vmax.f32 %v939_v47, 1.0 }
 0x193   : > { %v1921_v55 = vpop.eup %1920 }
 0x194   : > { %v1923_v58 = vpop.eup %1922  ;;  %1932 = vrcp.f32 %v966_v52  ;;  %v1198_v52 = vld [vmem:[#allocation2 + $0x58] sm:$0xff] }
 0x195   : > { %v948_v49 = vpop.xlane.xlu1 %947  ;;  %v945_v54 = vpop.xlane.xlu0 %944  ;;  %1934 = vrcp.f32 %v963_v53  ;;  %v1196_v53 = vld [vmem:[#allocation2 + $0x30] sm:$0xff] }
 0x196   : > { %1936 = vrcp.f32 %v965_v56  ;;  %v967_v9 = vmax.f32 %v945_v54, 1.0  ;;  %v968_v14 = vmax.f32 %v948_v49, 1.0  ;;  %v1199_v56 = vld [vmem:[#allocation2 + $0x18] sm:$0xff] }
 0x197   : > { %1938 = vrcp.f32 %v964_v59  ;;  %v1197_v59 = vld [vmem:[#allocation2] sm:$0xff] }
 0x199   : > { %v954_v0 = vpop.xlane.xlu1 %953  ;;  %v951_v3 = vpop.xlane.xlu0 %950 }
 0x19a   : > { %v970_v7 = vmax.f32 %v954_v0, 1.0  ;;  %v1925_v8 = vpop.eup %1924  ;;  %v969_v11 = vmax.f32 %v951_v3, 1.0 }
 0x19b   : > { %v1927_v10 = vpop.eup %1926 }
 0x19c   : > { %v1929_v13 = vpop.eup %1928  ;;  %1940 = vrcp.f32 %v970_v7  ;;  %v1201_v7 = vld [vmem:[#allocation2 + $0x68] sm:$0xff] }
 0x19d   : > { %v1931_v15 = vpop.eup %1930  ;;  %1942 = vrcp.f32 %v967_v9 }
 0x19e   : > { %1944 = vrcp.f32 %v969_v11 }
 0x19f   : > { %1946 = vrcp.f32 %v968_v14 }
 0x1a1   : > { %v1933_v25 = vpop.eup %1932 }
 0x1a2   : > { %v1935_v26 = vpop.eup %1934 }
 0x1a3   : > { %v1937_v29 = vpop.eup %1936 }
 0x1a4   : > { %v1939_v30 = vpop.eup %1938 }
 0x1a9   : > { %v1941_v41 = vpop.eup %1940 }
 0x1aa   : > { %v1943_v42 = vpop.eup %1942 }
 0x1ab   : > { %v1945_v44 = vpop.eup %1944 }
 0x1ac   : > { %v1947_v45 = vpop.eup %1946 }
 0x1bd   : > { %v1825_v48 = vpop.f32.mrf.mxu0 }
 0x1be   : > { %v1182_v1 = vmul.f32 %v1923_v58, %v1825_v48 }
 0x1bf   : > { %v1101_v51 = vpop.f32.mrf.mxu0 }
 0x1c0   : > { %v1180_v62 = vmul.f32 %v1917_v50, %v1101_v51 }
 0x1c1   : > { %v1826_v57 = vpop.f32.mrf.mxu0 }
 0x1c2   : > { %v1183_v60 = vmul.f32 %v1919_v38, %v1826_v57 }
 0x1c3   : > { %v1104_v61 = vpop.f32.mrf.mxu0 }
 0x1c4   : > { %v1181_v63 = vmul.f32 %v1921_v55, %v1104_v61  ;;  %v1213_v5 = vpack.c.bf16 %v1183_v60, %v1182_v1  ;;  %v1200_v1 = vld [vmem:[#allocation2 + $0x50] sm:$0xff] }
 0x1c5   : > { %v1829_v2 = vpop.f32.mrf.mxu0 }
 0x1c6   : > { %v1212_v4 = vpack.c.bf16 %v1181_v63, %v1180_v62  ;;  %v1186_v20 = vmul.f32 %v1929_v13, %v1829_v2  ;;  %v1202_v62 = vld [vmem:[#allocation2 + $0x8] sm:$0xff]  ;;  %v1204_v13 = vld [vmem:[#allocation2 + $0x40] sm:$0xff] }
 0x1c7   : > { %v1117_v6 = vpop.f32.mrf.mxu0 }
 0x1c8   : > { %1843 = vmatprep.mubr.msk.bf16.mxu1 %vm1236_vm3, %v1212_v4  ;;  %v1184_v18 = vmul.f32 %v1927_v10, %v1117_v6  ;;  %v1203_v4 = vld [vmem:[#allocation2 + $0x48] sm:$0xff]  ;;  %v1206_v10 = vld [vmem:[#allocation2 + $0x10] sm:$0xff] }
 0x1c9   : > { %v1830_v12 = vpop.f32.mrf.mxu0  ;;  %1844 = vmatmul.mubr.msk.bf16.vlgmr.msra.gmra.mxu1 %vm1236_vm3, %v1213_v5 }
 0x1ca   : > { %v1187_v16 = vmul.f32 %v1925_v8, %v1830_v12 }
 0x1cb   : > { %v1120_v17 = vpop.f32.mrf.mxu0 }
 0x1cc   : > { %v1185_v19 = vmul.f32 %v1931_v15, %v1120_v17  ;;  %v1215_v23 = vpack.c.bf16 %v1187_v16, %v1186_v20  ;;  %v1207_v16 = vld [vmem:[#allocation2 + $0x38] sm:$0xff] }
 0x1cd   : > { %v1833_v21 = vpop.f32.mrf.mxu0 }
 0x1ce   : > { %v1214_v22 = vpack.c.bf16 %v1185_v19, %v1184_v18  ;;  %v1190_v35 = vmul.f32 %v1937_v29, %v1833_v21  ;;  %v1205_v19 = vld [vmem:[#allocation2 + $0x20] sm:$0xff]  ;;  %v1211_v29 = vld [vmem:[#allocation2 + $0x28] sm:$0xff] }
 0x1cf   : > { %v1133_v24 = vpop.f32.mrf.mxu0 }
 0x1d0   : > { %1847 = vmatprep.mubr.msk.bf16.mxu1 %vm1236_vm3, %v1214_v22  ;;  %v1188_v33 = vmul.f32 %v1935_v26, %v1133_v24  ;;  %v1210_v22 = vld [vmem:[#allocation2 + $0x78] sm:$0xff] }
 0x1d1   : > { %v1834_v28 = vpop.f32.mrf.mxu0  ;;  %1848 = vmatmul.mubr.msk.bf16.gmra.mxu1 %vm1236_vm3, %v1215_v23 }
 0x1d2   : > { %v1191_v31 = vmul.f32 %v1933_v25, %v1834_v28  ;;  %v1208_v25 = vld [vmem:[#allocation2 + $0x60] sm:$0xff] }
 0x1d3   : > { %v1136_v32 = vpop.f32.mrf.mxu0 }
 0x1d4   : > { %v1189_v34 = vmul.f32 %v1939_v30, %v1136_v32  ;;  %v1217_v39 = vpack.c.bf16 %v1191_v31, %v1190_v35  ;;  %v1209_v32 = vld [vmem:[#allocation2 + $0x70] sm:$0xff] }
 0x1d5   : > { %v1837_v36 = vpop.f32.mrf.mxu0 }
 0x1d6   : > { %v1216_v37 = vpack.c.bf16 %v1189_v34, %v1188_v33  ;;  %v1194_v49 = vmul.f32 %v1945_v44, %v1837_v36 }
 0x1d7   : > { %v1149_v40 = vpop.f32.mrf.mxu0 }
 0x1d8   : > { %1851 = vmatprep.mubr.msk.bf16.mxu1 %vm1236_vm3, %v1216_v37  ;;  %v1192_v47 = vmul.f32 %v1943_v42, %v1149_v40 }
 0x1d9   : > { %v1838_v43 = vpop.f32.mrf.mxu0  ;;  %1852 = vmatmul.mubr.msk.bf16.gmra.mxu1 %vm1236_vm3, %v1217_v39 }
 0x1da   : > { %v1195_v27 = vmul.f32 %v1941_v41, %v1838_v43 }
 0x1db   : > { %v1152_v46 = vpop.f32.mrf.mxu0 }
 0x1dc   : > { %v1193_v48 = vmul.f32 %v1947_v45, %v1152_v46  ;;  %v1219_v51 = vpack.c.bf16 %v1195_v27, %v1194_v49 }
 0x1de   : > { %v1218_v50 = vpack.c.bf16 %v1193_v48, %v1192_v47 }
 0x1e0   : > { %1855 = vmatprep.mubr.msk.bf16.mxu1 %vm1236_vm3, %v1218_v50 }
 0x1e1   : > { %1856 = vmatmul.mubr.msk.bf16.gmra.mxu1 %vm1236_vm3, %v1219_v51 }
 0x289   : > { %v1845_v38 = vpop.f32.mrf.mxu1 }
 0x28a   : > { %v1360_v54 = vadd.f32 %v1845_v38, %v1198_v52 }
 0x28b   : > { %v1295_v55 = vpop.f32.mrf.mxu1 }
 0x28c   : > { %1376 = vst [vmem:[#allocation2 + $0x58] sm:$0xff] %v1360_v54  ;;  %v1358_v57 = vadd.f32 %v1295_v55, %v1196_v53 }
 0x28d   : > { %v1846_v58 = vpop.f32.mrf.mxu1 }
 0x28e   : > { %1374 = vst [vmem:[#allocation2 + $0x30] sm:$0xff] %v1358_v57  ;;  %v1361_v60 = vadd.f32 %v1846_v58, %v1199_v56 }
 0x28f   : > { %v1298_v61 = vpop.f32.mrf.mxu1 }
 0x290   : > { %1377 = vst [vmem:[#allocation2 + $0x18] sm:$0xff] %v1361_v60  ;;  %v1359_v63 = vadd.f32 %v1298_v61, %v1197_v59 }
 0x291   : > { %v1849_v0 = vpop.f32.mrf.mxu1 }
 0x292   : > { %1375 = vst [vmem:[#allocation2] sm:$0xff] %v1359_v63  ;;  %v1364_v2 = vadd.f32 %v1849_v0, %v1202_v62 }
 0x293   : > { %v1311_v3 = vpop.f32.mrf.mxu1 }
 0x294   : > { %1380 = vst [vmem:[#allocation2 + $0x8] sm:$0xff] %v1364_v2  ;;  %v1362_v5 = vadd.f32 %v1311_v3, %v1200_v1 }
 0x295   : > { %v1850_v6 = vpop.f32.mrf.mxu1 }
 0x296   : > { %1378 = vst [vmem:[#allocation2 + $0x50] sm:$0xff] %v1362_v5  ;;  %v1365_v8 = vadd.f32 %v1850_v6, %v1203_v4 }
 0x297   : > { %v1314_v9 = vpop.f32.mrf.mxu1 }
 0x298   : > { %1381 = vst [vmem:[#allocation2 + $0x48] sm:$0xff] %v1365_v8  ;;  %v1363_v11 = vadd.f32 %v1314_v9, %v1201_v7 }
 0x299   : > { %v1853_v12 = vpop.f32.mrf.mxu1 }
 0x29a   : > { %1379 = vst [vmem:[#allocation2 + $0x68] sm:$0xff] %v1363_v11  ;;  %v1368_v14 = vadd.f32 %v1853_v12, %v1206_v10 }
 0x29b   : > { %v1327_v15 = vpop.f32.mrf.mxu1 }
 0x29c   : > { %1384 = vst [vmem:[#allocation2 + $0x10] sm:$0xff] %v1368_v14  ;;  %v1366_v17 = vadd.f32 %v1327_v15, %v1204_v13 }
 0x29d   : > { %v1854_v18 = vpop.f32.mrf.mxu1 }
 0x29e   : > { %1382 = vst [vmem:[#allocation2 + $0x40] sm:$0xff] %v1366_v17  ;;  %v1369_v20 = vadd.f32 %v1854_v18, %v1207_v16 }
 0x29f   : > { %v1330_v21 = vpop.f32.mrf.mxu1 }
 0x2a0   : > { %1385 = vst [vmem:[#allocation2 + $0x38] sm:$0xff] %v1369_v20  ;;  %v1367_v23 = vadd.f32 %v1330_v21, %v1205_v19 }
 0x2a1   : > { %v1857_v24 = vpop.f32.mrf.mxu1 }
 0x2a2   : > { %1383 = vst [vmem:[#allocation2 + $0x20] sm:$0xff] %v1367_v23  ;;  %v1372_v26 = vadd.f32 %v1857_v24, %v1210_v22 }
 0x2a3   : > { %v1343_v28 = vpop.f32.mrf.mxu1 }
 0x2a4   : > { %1388 = vst [vmem:[#allocation2 + $0x78] sm:$0xff] %v1372_v26  ;;  %v1370_v30 = vadd.f32 %v1343_v28, %v1208_v25 }
 0x2a5   : > { %v1858_v31 = vpop.f32.mrf.mxu1 }
 0x2a6   : > { %1386 = vst [vmem:[#allocation2 + $0x60] sm:$0xff] %v1370_v30  ;;  %v1373_v33 = vadd.f32 %v1858_v31, %v1211_v29  ;;  %1393 = sbr.rel (%p1740_p6) target bundleno = 874 (0x36a), region = 56 }
 0x2a7   : > { %v1346_v34 = vpop.f32.mrf.mxu1 }
 0x2a8   : > { %1389 = vst [vmem:[#allocation2 + $0x28] sm:$0xff] %v1373_v33  ;;  %v1371_v35 = vadd.f32 %v1346_v34, %v1209_v32 }
 0x2aa   : > { %1387 = vst [vmem:[#allocation2 + $0x70] sm:$0xff] %v1371_v35 }
 0x2ab   : > { %v1396_v36 = vld [vmem:[#allocation2 + $0x58] sm:$0xff]  ;;  %v1394_v37 = vld [vmem:[#allocation2 + $0x30] sm:$0xff]  ;;  %v1395_v43 = vld [vmem:[#allocation2] sm:$0xff] }
 0x2ac   : > { %v1397_v39 = vld [vmem:[#allocation2 + $0x18] sm:$0xff]  ;;  %v2313_v40 = vmax.f32 %v1396_v36, 0.0  ;;  %v2315_v41 = vmax.f32 %v1394_v37, 0.0  ;;  %v2319_v44 = vmax.f32 %v1395_v43, 0.0  ;;  %v1399_v45 = vld [vmem:[#allocation2 + $0x68] sm:$0xff]  ;;  %v1398_v27 = vld [vmem:[#allocation2 + $0x50] sm:$0xff] }
 0x2ad   : > { %v2317_v42 = vmax.f32 %v1397_v39, 0.0  ;;  %v2329_v50 = vmax.f32 %v1399_v45, 0.0  ;;  %v2331_v51 = vmax.f32 %v1398_v27, 0.0  ;;  %v1401_v52 = vld [vmem:[#allocation2 + $0x48] sm:$0xff]  ;;  %v1403_v57 = vld [vmem:[#allocation2 + $0x20] sm:$0xff]  ;;  %v1405_v63 = vld [vmem:[#allocation2 + $0x38] sm:$0xff] }
 0x2ae   : > { %v1428_v46 = vmul.f32 %v2313_v40, %v2313_v40  ;;  %v1426_v47 = vmul.f32 %v2315_v41, %v2315_v41  ;;  %v1427_v49 = vmul.f32 %v2319_v44, %v2319_v44  ;;  %v1400_v38 = vld [vmem:[#allocation2 + $0x8] sm:$0xff]  ;;  %v2337_v55 = vmax.f32 %v1401_v52, 0.0  ;;  %v1402_v58 = vld [vmem:[#allocation2 + $0x40] sm:$0xff]  ;;  %v1404_v0 = vld [vmem:[#allocation2 + $0x10] sm:$0xff] }
 0x2af   : > { %v1429_v48 = vmul.f32 %v2317_v42, %v2317_v42  ;;  %v1431_v53 = vmul.f32 %v2329_v50, %v2329_v50  ;;  %v1430_v54 = vmul.f32 %v2331_v51, %v2331_v51  ;;  %v2339_v56 = vmax.f32 %v1400_v38, 0.0  ;;  %v1406_v6 = vld [vmem:[#allocation2 + $0x60] sm:$0xff]  ;;  %v1409_v11 = vld [vmem:[#allocation2 + $0x28] sm:$0xff]  ;;  %v1408_v12 = vld [vmem:[#allocation2 + $0x78] sm:$0xff] }
 0x2b0   : > { %1446 = vadd.xlane.f32.xlu1 %v1428_v46  ;;  %1442 = vadd.xlane.f32.xlu0 %v1426_v47  ;;  %v1433_v59 = vmul.f32 %v2337_v55, %v2337_v55  ;;  %v2345_v61 = vmax.f32 %v1403_v57, 0.0  ;;  %v2347_v62 = vmax.f32 %v1402_v58, 0.0  ;;  %v2353_v3 = vmax.f32 %v1405_v63, 0.0 }
 0x2b1   : > { %v1432_v60 = vmul.f32 %v2339_v56, %v2339_v56  ;;  %v2355_v4 = vmax.f32 %v1404_v0, 0.0  ;;  %v1407_v5 = vld [vmem:[#allocation2 + $0x70] sm:$0xff]  ;;  %v2363_v10 = vmax.f32 %v1406_v6, 0.0  ;;  %v2369_v15 = vmax.f32 %v1409_v11, 0.0 }
 0x2b2   : > { %v1435_v1 = vmul.f32 %v2345_v61, %v2345_v61  ;;  %v1434_v2 = vmul.f32 %v2347_v62, %v2347_v62  ;;  %v1437_v7 = vmul.f32 %v2353_v3, %v2353_v3  ;;  %v2361_v9 = vmax.f32 %v1407_v5, 0.0 }
 0x2b3   : > { %v1436_v8 = vmul.f32 %v2355_v4, %v2355_v4  ;;  %v1438_v14 = vmul.f32 %v2363_v10, %v2363_v10  ;;  %v2371_v16 = vmax.f32 %v1408_v12, 0.0  ;;  %v1441_v17 = vmul.f32 %v2369_v15, %v2369_v15 }
 0x2b4   : > { %1448 = vadd.xlane.f32.xlu1 %v1429_v48  ;;  %1444 = vadd.xlane.f32.xlu0 %v1427_v49  ;;  %v1439_v13 = vmul.f32 %v2361_v9, %v2361_v9 }
 0x2b5   : > { %v1440_v18 = vmul.f32 %v2371_v16, %v2371_v16 }
 0x2b8   : > { %1452 = vadd.xlane.f32.xlu1 %v1431_v53  ;;  %1450 = vadd.xlane.f32.xlu0 %v1430_v54 }
 0x2bc   : > { %1456 = vadd.xlane.f32.xlu1 %v1433_v59  ;;  %1454 = vadd.xlane.f32.xlu0 %v1432_v60 }
 0x2c0   : > { %1460 = vadd.xlane.f32.xlu1 %v1435_v1  ;;  %1458 = vadd.xlane.f32.xlu0 %v1434_v2 }
 0x2c4   : > { %1464 = vadd.xlane.f32.xlu1 %v1437_v7  ;;  %1462 = vadd.xlane.f32.xlu0 %v1436_v8 }
 0x2c8   : > { %1468 = vadd.xlane.f32.xlu1 %v1439_v13  ;;  %1466 = vadd.xlane.f32.xlu0 %v1438_v14 }
 0x2cc   : > { %1472 = vadd.xlane.f32.xlu1 %v1441_v17  ;;  %1470 = vadd.xlane.f32.xlu0 %v1440_v18 }
 0x339   : > { %v1447_v19 = vpop.xlane.xlu1 %1446  ;;  %v1443_v20 = vpop.xlane.xlu0 %1442 }
 0x33a   : > { %v1476_v21 = vmax.f32 %v1447_v19, 1e-24  ;;  %v1474_v22 = vmax.f32 %v1443_v20, 1e-24 }
 0x33c   : > { %1948 = vrsqrt.f32 %v1476_v21 }
 0x33d   : > { %1950 = vrsqrt.f32 %v1474_v22  ;;  %v1449_v23 = vpop.xlane.xlu1 %1448  ;;  %v1445_v24 = vpop.xlane.xlu0 %1444 }
 0x33e   : > { %v1477_v25 = vmax.f32 %v1449_v23, 1e-24  ;;  %v1475_v26 = vmax.f32 %v1445_v24, 1e-24 }
 0x340   : > { %1952 = vrsqrt.f32 %v1477_v25 }
 0x341   : > { %1954 = vrsqrt.f32 %v1475_v26  ;;  %v1453_v28 = vpop.xlane.xlu1 %1452  ;;  %v1451_v29 = vpop.xlane.xlu0 %1450 }
 0x342   : > { %v1479_v30 = vmax.f32 %v1453_v28, 1e-24  ;;  %v1478_v31 = vmax.f32 %v1451_v29, 1e-24 }
 0x344   : > { %1956 = vrsqrt.f32 %v1479_v30 }
 0x345   : > { %1958 = vrsqrt.f32 %v1478_v31  ;;  %v1457_v32 = vpop.xlane.xlu1 %1456  ;;  %v1455_v33 = vpop.xlane.xlu0 %1454 }
 0x346   : > { %v1481_v34 = vmax.f32 %v1457_v32, 1e-24  ;;  %v1480_v35 = vmax.f32 %v1455_v33, 1e-24 }
 0x348   : > { %1960 = vrsqrt.f32 %v1481_v34 }
 0x349   : > { %v1949_v36 = vpop.eup %1948  ;;  %1962 = vrsqrt.f32 %v1480_v35  ;;  %v1461_v37 = vpop.xlane.xlu1 %1460 }
 0x34a   : > { %v1459_v39 = vpop.xlane.xlu0 %1458  ;;  %v1951_v43 = vpop.eup %1950  ;;  %v1508_v45 = vmul.f32 %v1949_v36, %v2313_v40  ;;  %v1483_v27 = vmax.f32 %v1461_v37, 1e-24 }
 0x34b   : > { %v1482_v46 = vmax.f32 %v1459_v39, 1e-24  ;;  %v1506_v47 = vmul.f32 %v1951_v43, %v2315_v41 }
 0x34c   : > { %1524 = vst [vmem:[#allocation4 + $0x10] sm:$0xff] %v1508_v45  ;;  %1964 = vrsqrt.f32 %v1483_v27 }
 0x34d   : > { %v1953_v48 = vpop.eup %1952  ;;  %1522 = vst [vmem:[#allocation4] sm:$0xff] %v1506_v47  ;;  %1966 = vrsqrt.f32 %v1482_v46  ;;  %v1465_v49 = vpop.xlane.xlu1 %1464 }
 0x34e   : > { %v1463_v52 = vpop.xlane.xlu0 %1462  ;;  %v1955_v38 = vpop.eup %1954  ;;  %v1509_v53 = vmul.f32 %v1953_v48, %v2317_v42  ;;  %v1485_v54 = vmax.f32 %v1465_v49, 1e-24 }
 0x34f   : > { %v1484_v57 = vmax.f32 %v1463_v52, 1e-24  ;;  %v1507_v58 = vmul.f32 %v1955_v38, %v2319_v44 }
 0x350   : > { %1525 = vst [vmem:[#allocation4 + $0x18] sm:$0xff] %v1509_v53  ;;  %1968 = vrsqrt.f32 %v1485_v54 }
 0x351   : > { %v1957_v40 = vpop.eup %1956  ;;  %1523 = vst [vmem:[#allocation4 + $0x8] sm:$0xff] %v1507_v58  ;;  %1970 = vrsqrt.f32 %v1484_v57  ;;  %v1469_v41 = vpop.xlane.xlu1 %1468 }
 0x352   : > { %v1467_v59 = vpop.xlane.xlu0 %1466  ;;  %v1959_v60 = vpop.eup %1958  ;;  %v1511_v63 = vmul.f32 %v1957_v40, %v2329_v50  ;;  %v1487_v0 = vmax.f32 %v1469_v41, 1e-24 }
 0x353   : > { %v1486_v1 = vmax.f32 %v1467_v59, 1e-24  ;;  %v1510_v2 = vmul.f32 %v1959_v60, %v2331_v51 }
 0x354   : > { %1527 = vst [vmem:[#allocation4 + $0x28] sm:$0xff] %v1511_v63  ;;  %1972 = vrsqrt.f32 %v1487_v0 }
 0x355   : > { %v1961_v42 = vpop.eup %1960  ;;  %1526 = vst [vmem:[#allocation4 + $0x20] sm:$0xff] %v1510_v2  ;;  %1974 = vrsqrt.f32 %v1486_v1  ;;  %v1473_v44 = vpop.xlane.xlu1 %1472 }
 0x356   : > { %v1471_v5 = vpop.xlane.xlu0 %1470  ;;  %v1963_v6 = vpop.eup %1962  ;;  %v1513_v7 = vmul.f32 %v1961_v42, %v2337_v55  ;;  %v1489_v8 = vmax.f32 %v1473_v44, 1e-24 }
 0x357   : > { %v1488_v11 = vmax.f32 %v1471_v5, 1e-24  ;;  %v1512_v12 = vmul.f32 %v1963_v6, %v2339_v56 }
 0x358   : > { %1529 = vst [vmem:[#allocation4 + $0x38] sm:$0xff] %v1513_v7  ;;  %1976 = vrsqrt.f32 %v1489_v8 }
 0x359   : > { %v1965_v50 = vpop.eup %1964  ;;  %1528 = vst [vmem:[#allocation4 + $0x30] sm:$0xff] %v1512_v12  ;;  %1978 = vrsqrt.f32 %v1488_v11 }
 0x35a   : > { %v1967_v51 = vpop.eup %1966  ;;  %v1515_v13 = vmul.f32 %v1965_v50, %v2345_v61 }
 0x35b   : > { %v1514_v14 = vmul.f32 %v1967_v51, %v2347_v62 }
 0x35c   : > { %1531 = vst [vmem:[#allocation4 + $0x48] sm:$0xff] %v1515_v13 }
 0x35d   : > { %v1969_v17 = vpop.eup %1968  ;;  %1530 = vst [vmem:[#allocation4 + $0x40] sm:$0xff] %v1514_v14 }
 0x35e   : > { %v1971_v18 = vpop.eup %1970  ;;  %v1517_v55 = vmul.f32 %v1969_v17, %v2353_v3 }
 0x35f   : > { %v1516_v19 = vmul.f32 %v1971_v18, %v2355_v4 }
 0x360   : > { %1533 = vst [vmem:[#allocation4 + $0x58] sm:$0xff] %v1517_v55 }
 0x361   : > { %v1973_v56 = vpop.eup %1972  ;;  %1532 = vst [vmem:[#allocation4 + $0x50] sm:$0xff] %v1516_v19 }
 0x362   : > { %v1975_v20 = vpop.eup %1974  ;;  %v1519_v21 = vmul.f32 %v1973_v56, %v2361_v9 }
 0x363   : > { %v1518_v22 = vmul.f32 %v1975_v20, %v2363_v10 }
 0x364   : > { %1535 = vst [vmem:[#allocation4 + $0x68] sm:$0xff] %v1519_v21 }
 0x365   : > { %v1977_v61 = vpop.eup %1976  ;;  %1534 = vst [vmem:[#allocation4 + $0x60] sm:$0xff] %v1518_v22 }
 0x366   : > { %v1979_v62 = vpop.eup %1978  ;;  %v1521_v23 = vmul.f32 %v1977_v61, %v2369_v15 }
 0x367   : > { %v1520_v24 = vmul.f32 %v1979_v62, %v2371_v16 }
 0x368   : > { %1537 = vst [vmem:[#allocation4 + $0x78] sm:$0xff] %v1521_v23 }
 0x369   : > { %1536 = vst [vmem:[#allocation4 + $0x70] sm:$0xff] %v1520_v24 }
 0x36a PF: > { %p2395_p7 = scmp.eq.s32.totalorder %s1648_s27, 2  ;;  %s2034_s11 = smov [#allocation4]  }
 0x36b   : > { %s1547_s14 = sshll.u32 %s2034_s11, 4  ;;  %s1548_s14 = int_to_ptr.vmem [resolvable:$true] %s1547_s14 }
 0x36c   : > { %s1980_s12 = scalar_lea.vmem %s1548_s14, 2048  ;;  %p1987_p11 = scmp.lt.s32.totalorder %s1548_s14, %s1548_s14 }
 0x36d   : > { %p1981_p8 = scmp.ne.s32.totalorder %s1548_s14, %s1980_s12  ;;  %p1988_p12 = scmp.lt.s32.totalorder %s1980_s12, %s1980_s12 }
 0x36f   : > { %p1982_p9 = pnand %p1981_p8, %p2395_p7  ;;  %p1989_p13 = por %p1988_p12, %p1987_p11 }
 0x371   : > { %p1983_p10 = pneg %p1982_p9 }
 0x373   : > { %p1990_p0 = pnand %p1989_p13, %p1983_p10 }
 0x375   : > { %1993 = shalt.err (!%p1990_p0)
}
 0x376   : > { %s2035_s13 = smov 128   ;;  %s2036_s27 = smov 8  }
 0x377   : > { %1864 = dma.vmem_to_hbm [thread:$0]  (%p2395_p7), %s1548_s14, 2048, %s2426_s7, [#allocation5], %s2035_s13, %s2035_s13, %s2036_s27  }
 0x378   : > { %2017 = dma.done.wait (%p2395_p7), [#allocation5], 2048  }
 0x379   : > { %2019 = vsyncadd (%p2395_p7), [#allocation5], 4294965248 }
 0x37a PF: > { %s18_s26 = sadd.s32 1, %s2030_s26   ;;  %s2428_s24 = smov %s2026_s25 }
 0x37b   : > { %p15_p1 = scmp.ge.s32.totalorder %s18_s26, 5   ;;  %s2429_s25 = smov %s2431_s28 }
 0x37d   :  { %17 = sbr.rel (!%p15_p1) target bundleno = 2 (0x2), region = 93 }
 0x382   :  { %1563 = vsyncpa [#allocation5], 1 }
 0x383   :  { %1565 = vsyncpa [#allocation5 + $0x1], 1 }

</bundles_post_ra>
